<compile_context>
chip_gen: v5e
topology: v5e:2x2
jax: 0.10.0
libtpu: 0.0.40
codegen_flags: <defaults>
</compile_context>

<pallas_src>
import functools

import numpy as np
import jax
import jax.numpy as jnp
from jax.experimental import pallas as pl
from jax.experimental.pallas import tpu as pltpu

STRIDE = 16
KERNELS = (16, 32, 64, 128)
PADS = (0, 8, 24, 56)
KW = 128                    # largest receptive field (shared window)
PW = 56                     # largest padding
NSHIFT = KW // STRIDE       # 8 frame shifts cover the 128-sample window
BN_EPS = 1e-5
LANE = 128
SUBLANE = 8


def _round_up(x, m):
    return ((x + m - 1) // m) * m


# ----------------------------------------------------------------------------------- #
# Kernel                                                                               #
# ----------------------------------------------------------------------------------- #
def _multi_features_kernel(f_ref, w_ref, b_ref, wf_ref, bf_ref, out_ref, *, tm, rc):
    """One (batch, row-tile) grid step.

    f_ref : (1, F, C_in*16)   non-duplicated frames of this batch element (resident)
    w_ref : (8, C_in*16, C_pad) BN-folded branch weights, one slab per frame shift
    b_ref : (1, C_pad)        folded branch bias (f32)
    wf_ref: (C_pad, C_pad)    1x1 fusion conv weight
    bf_ref: (1, C_pad)        fusion bias (f32)
    out_ref:(1, TM, C_pad)
    """
    t = pl.program_id(1)
    base = pl.multiple_of(t * tm, SUBLANE)
    c_pad = out_ref.shape[-1]

    # Sub-chunk the row tile so the f32 intermediate fits the vreg budget and the
    # epilogue of chunk i overlaps matmul-1 of chunk i+1.
    for r0 in range(0, tm, rc):
        start = pl.multiple_of(base + r0, SUBLANE)
        # Aligned slab of rc+8 frames; shift j uses rows [j, j+rc).
        slab = f_ref[0, pl.ds(start, rc + SUBLANE), :]
        acc = jnp.zeros((rc, c_pad), jnp.float32)
        # All four conv branches as 8 shifted matmuls on the de-duplicated frames.
        for j in range(NSHIFT):
            acc = acc + jnp.dot(slab[j:j + rc], w_ref[j],
                                preferred_element_type=jnp.float32)
        # Folded BN bias + ReLU6 (f32 on the VPU), then the 1x1 fusion conv + bias.
        h = jnp.clip(acc + b_ref[...], 0.0, 6.0)
        out = jnp.dot(h.astype(wf_ref.dtype), wf_ref[...],
                      preferred_element_type=jnp.float32)
        out_ref[0, r0:r0 + rc, :] = (out + bf_ref[...]).astype(out_ref.dtype)


# ----------------------------------------------------------------------------------- #
# Parameter folding (done once per parameter set, not per forward call)               #
# ----------------------------------------------------------------------------------- #
def fold_params(params, *, compute_dtype=jnp.bfloat16):
    """Fold eval-mode BatchNorm into the conv weights and embed all four branches and
    the 1x1 fusion conv into lane-padded matrices."""
    c_sizes = [int(br[0].shape[0]) for br in params["branches"]]
    c_total = int(sum(c_sizes))
    lane_mult = LANE if c_total <= LANE else 2 * LANE    # 256-wide MXU on v6e/v7x
    c_pad = _round_up(max(c_total, LANE), lane_mult)

    w_blocks, b_parts = [], []
    for (w, b, gamma, beta, mean, var), K, P in zip(params["branches"], KERNELS, PADS):
        scale = gamma / jnp.sqrt(var + BN_EPS)
        w_fold = (w * scale[:, None, None]).transpose(1, 2, 0)        # (C_in, K, c_out)
        off = PW - P                                                  # offset in 128-window
        w_blocks.append(jnp.pad(w_fold, ((0, 0), (off, KW - off - K), (0, 0))))
        b_parts.append((b - mean) * scale + beta)

    c_in = int(w_blocks[0].shape[0])
    w_all = jnp.concatenate(w_blocks, axis=-1)                        # (C_in, 128, C_total)
    w_all = jnp.pad(w_all, ((0, 0), (0, 0), (0, c_pad - c_total)))
    # (C_in, 8, 16, C_pad) -> (8, C_in, 16, C_pad) -> (8, C_in*16, C_pad):
    # one weight slab per frame shift, matching the (c, s) feature layout of a frame.
    w_all = w_all.reshape(c_in, NSHIFT, STRIDE, c_pad).transpose(1, 0, 2, 3)
    w_all = w_all.reshape(NSHIFT, c_in * STRIDE, c_pad).astype(compute_dtype)

    b_all = jnp.pad(jnp.concatenate(b_parts),
                    (0, c_pad - c_total))[None, :].astype(jnp.float32)

    wf, bf = params["fusion"]                                         # wf: (C_tot, C_tot, 1)
    wf_pad = jnp.pad(wf[:, :, 0].T, ((0, c_pad - c_total), (0, c_pad - c_total)))
    wf_pad = wf_pad.astype(compute_dtype)
    bf_pad = jnp.pad(bf, (0, c_pad - c_total))[None, :].astype(jnp.float32)

    return dict(w=w_all, b=b_all, wf=wf_pad, bf=bf_pad,
                c_in=c_in, c_total=c_total, c_pad=c_pad)


# ----------------------------------------------------------------------------------- #
# Tiling / VMEM budget                                                                 #
# ----------------------------------------------------------------------------------- #
def _pick_tile(T, B, D, c_pad, in_itemsize, out_itemsize, weight_bytes, tm):
    try:
        vmem_cap = int(pltpu.get_tpu_info().vmem_capacity_bytes)
    except Exception:
        vmem_cap = 64 * 1024 * 1024                  # conservative: v7x per-core VMEM
    vmem_limit = int(min(vmem_cap * 3 // 4, 100 * 1024 * 1024))
    budget = vmem_limit - 6 * 1024 * 1024            # headroom for intermediates

    max_tm = _round_up(T, SUBLANE)
    if B == 1 and T >= 2 * SUBLANE:
        # v7x has 2 TensorCores: keep >= 2 grid steps so the parallel axis can split.
        max_tm = _round_up((T + 1) // 2, SUBLANE)

    candidates = (2048, 1024, 512, 256, 128, 64, 32, 16, 8) if tm is None else (int(tm),)
    chosen = SUBLANE
    for cand in candidates:
        cand = max(SUBLANE, min(cand, max_tm))
        if cand > 256:
            cand = (cand // 256) * 256               # keep the in-kernel 256-row chunking exact
        t_pad = _round_up(T, cand)
        frames_bytes = 2 * (t_pad + NSHIFT) * D * in_itemsize   # double-buffered frames
        out_bytes = 2 * cand * c_pad * out_itemsize             # double-buffered output
        if frames_bytes + out_bytes + weight_bytes <= budget:
            chosen = cand
            break
    return chosen, vmem_limit


# ----------------------------------------------------------------------------------- #
# Forward                                                                              #
# ----------------------------------------------------------------------------------- #
def multi_features_forward(x, folded, *, compute_dtype=jnp.bfloat16, out_dtype=None,
                           tm=None):
    """x: (B, C_in, L) like the PyTorch Conv1d input.  Returns (B, C_total, T)."""
    B, C_in, L = x.shape
    assert L % STRIDE == 0, "length must be divisible by the stride (16)"
    assert C_in == folded["c_in"]
    T = L // STRIDE
    D = C_in * STRIDE
    c_pad, c_total = folded["c_pad"], folded["c_total"]
    out_dtype = compute_dtype if out_dtype is None else out_dtype

    weight_bytes = (folded["w"].size * folded["w"].dtype.itemsize
                    + folded["wf"].size * folded["wf"].dtype.itemsize
                    + (folded["b"].size + folded["bf"].size) * 4)
    TM, vmem_limit = _pick_tile(T, B, D, c_pad,
                                jnp.dtype(compute_dtype).itemsize,
                                jnp.dtype(out_dtype).itemsize, weight_bytes, tm)
    RC = TM if TM <= 256 else 256                    # row sub-chunk inside the kernel
    t_pad = _round_up(T, TM)
    n_t = t_pad // TM
    F = t_pad + NSHIFT                               # frames per batch element (+ zero tail)

    # Non-duplicated frame layout (B, F, C_in*16): every input sample appears exactly once
    # (vs. the 8x-inflated im2col); the kernel rebuilds the 128-wide window via 8 shifts.
    x_pad = jnp.pad(x, ((0, 0), (0, 0), (PW, STRIDE * F - L - PW)))
    frames = x_pad.reshape(B, C_in, F, STRIDE).transpose(0, 2, 1, 3)
    frames = frames.reshape(B, F, D).astype(compute_dtype)

    kernel = functools.partial(_multi_features_kernel, tm=TM, rc=RC)

    def call(single_buffer_weights):
        def const_spec(shape):
            kwargs = ({"pipeline_mode": pl.Buffered(1)}
                      if single_buffer_weights else {})
            return pl.BlockSpec(shape, lambda *_: (0,) * len(shape), **kwargs)

        return pl.pallas_call(
            kernel,
            out_shape=jax.ShapeDtypeStruct((B, t_pad, c_pad), out_dtype),
            grid=(B, n_t),
            in_specs=[
                pl.BlockSpec((1, F, D), lambda b, t: (b, 0, 0)),   # per-batch resident frames
                const_spec((NSHIFT, D, c_pad)),                    # folded branch weights
                const_spec((1, c_pad)),                            # folded branch bias
                const_spec((c_pad, c_pad)),                        # fusion weight
                const_spec((1, c_pad)),                            # fusion bias
            ],
            out_specs=pl.BlockSpec((1, TM, c_pad), lambda b, t: (b, t, 0)),
            compiler_params=pltpu.CompilerParams(
                dimension_semantics=("parallel", "parallel"),
                vmem_limit_bytes=vmem_limit,
            ),
        )(frames, folded["w"], folded["b"], folded["wf"], folded["bf"])

    try:
        out_padded = jax.block_until_ready(call(True))
    except Exception:
        # Fallback if this JAX build rejects single-buffered (pl.Buffered(1)) specs.
        out_padded = jax.block_until_ready(call(False))

    out = out_padded[:, :T, :c_total]
    return out.transpose(0, 2, 1)                    # PyTorch NCL layout (B, C_total, T)


# ----------------------------------------------------------------------------------- #
# Reference + parameter init                                                           #
# ----------------------------------------------------------------------------------- #
def init_params(key, in_channels, out_channels):
    ks = jax.random.split(key, 32)
    branches = []
    idx = 0
    for c_out, K in zip(out_channels, KERNELS):
        w = 0.1 * jax.random.normal(ks[idx], (c_out, in_channels, K), jnp.float32); idx += 1
        b = 0.1 * jax.random.normal(ks[idx], (c_out,), jnp.float32); idx += 1
        gamma = 1.0 + 0.1 * jax.random.normal(ks[idx], (c_out,), jnp.float32); idx += 1
        beta = 0.1 * jax.random.normal(ks[idx], (c_out,), jnp.float32); idx += 1
        mean = 0.1 * jax.random.normal(ks[idx], (c_out,), jnp.float32); idx += 1
        var = jax.random.uniform(ks[idx], (c_out,), jnp.float32, 0.5, 1.5); idx += 1
        branches.append((w, b, gamma, beta, mean, var))
    c_total = sum(out_channels)
    wf = 0.1 * jax.random.normal(ks[idx], (c_total, c_total, 1), jnp.float32); idx += 1
    bf = 0.1 * jax.random.normal(ks[idx], (c_total,), jnp.float32)
    return {"branches": branches, "fusion": (wf, bf)}


def reference_forward(x, params):
    """Pure-JAX reference mirroring the PyTorch forward (eval-mode BatchNorm)."""
    prec = jax.lax.Precision.HIGHEST
    outs = []
    for (w, b, gamma, beta, mean, var), K, P in zip(params["branches"], KERNELS, PADS):
        y = jax.lax.conv_general_dilated(
            x, w, window_strides=(STRIDE,), padding=[(P, P)],
            dimension_numbers=("NCH", "OIH", "NCH"), precision=prec)
        y = y + b[None, :, None]
        inv = 1.0 / jnp.sqrt(var + BN_EPS)
        y = gamma[None, :, None] * (y - mean[None, :, None]) * inv[None, :, None] \
            + beta[None, :, None]
        outs.append(jnp.clip(y, 0.0, 6.0))
    h = jnp.concatenate(outs, axis=1)
    wf, bf = params["fusion"]
    return jnp.einsum("bcl,oc->bol", h, wf[:, :, 0], precision=prec) + bf[None, :, None]


if __name__ == "__main__":
    key = jax.random.PRNGKey(0)
    k_x, k_p = jax.random.split(key)

    # Small shapes: batch=2, in_channels=4, length=128 -> T = 128/16 = 8
    B, C_in, L = 2, 4, 128
    # layer_fusion1 assumes total channels == out_channels1 * 4 -> equal widths
    out_channels = (8, 8, 8, 8)

    x = jax.random.normal(k_x, (B, C_in, L), jnp.float32)
    params = init_params(k_p, C_in, out_channels)
    ref = reference_forward(x, params)

    # f32 path: correctness check (tolerance covers TPU matmul pass differences).
    folded_f32 = fold_params(params, compute_dtype=jnp.float32)
    out_f32 = jax.block_until_ready(
        multi_features_forward(x, folded_f32, compute_dtype=jnp.float32,
                               out_dtype=jnp.float32))
    np.testing.assert_allclose(np.asarray(out_f32), np.asarray(ref),
                               rtol=1e-2, atol=1e-2)

    # bf16 path (perf config: bf16 compute, bf16 output straight from the kernel).
    folded_bf16 = fold_params(params, compute_dtype=jnp.bfloat16)
    out_bf16 = jax.block_until_ready(
        multi_features_forward(x, folded_bf16, compute_dtype=jnp.bfloat16))
    np.testing.assert_allclose(np.asarray(out_bf16.astype(jnp.float32)), np.asarray(ref),
                               rtol=5e-2, atol=2e-1)

    print("KERNEL_OK")
</pallas_src>

<mosaic_0001>
module attributes {stable_mosaic.version = 11 : i64} {
  func.func @_multi_features_kernel(%arg0: i32, %arg1: i32, %arg2: memref<1x16x64xf32, #tpu.memory_space<vmem>>, %arg3: memref<8x64x128xf32, #tpu.memory_space<vmem>>, %arg4: memref<1x128xf32, #tpu.memory_space<vmem>>, %arg5: memref<128x128xf32, #tpu.memory_space<vmem>>, %arg6: memref<1x128xf32, #tpu.memory_space<vmem>>, %arg7: memref<1x8x128xf32, #tpu.memory_space<vmem>>) attributes {dimension_semantics = [#tpu.dimension_semantics<parallel>, #tpu.dimension_semantics<parallel>], iteration_bounds = array<i64: 2, 1>, scalar_prefetch = 0 : i64, scratch_operands = 0 : i64, tpu.core_type = #tpu.core_type<tc>, window_params = [{transform_indices = @transform_0, window_bounds = array<i64: 1, 16, 64>}, {pipeline_mode = #tpu.pipeline_mode<synchronous>, transform_indices = @transform_1, window_bounds = array<i64: 8, 64, 128>}, {pipeline_mode = #tpu.pipeline_mode<synchronous>, transform_indices = @transform_2, window_bounds = array<i64: 1, 128>}, {pipeline_mode = #tpu.pipeline_mode<synchronous>, transform_indices = @transform_3, window_bounds = array<i64: 128, 128>}, {pipeline_mode = #tpu.pipeline_mode<synchronous>, transform_indices = @transform_4, window_bounds = array<i64: 1, 128>}, {transform_indices = @transform_5, window_bounds = array<i64: 1, 8, 128>}]} {
    %c8_i32 = arith.constant 8 : i32
    %0 = arith.muli %arg1, %c8_i32 : i32
    %1 = tpu.assume_multiple %0, 8 : i32
    %c0_i32 = arith.constant 0 : i32
    %2 = arith.addi %1, %c0_i32 : i32
    %3 = tpu.assume_multiple %2, 8 : i32
    %c0 = arith.constant 0 : index
    %4 = arith.index_cast %3 : i32 to index
    %c0_0 = arith.constant 0 : index
    %5 = vector.load %arg2[%c0, %4, %c0_0] : memref<1x16x64xf32, #tpu.memory_space<vmem>>, vector<1x16x64xf32>
    %6 = vector.shape_cast %5 : vector<1x16x64xf32> to vector<16x64xf32>
    %cst = arith.constant 0.000000e+00 : f32
    %7 = vector.broadcast %cst : f32 to vector<8x128xf32>
    %8 = vector.extract_strided_slice %6 {offsets = [0, 0], sizes = [8, 64], strides = [1, 1]} : vector<16x64xf32> to vector<8x64xf32>
    %c0_1 = arith.constant 0 : index
    %c0_2 = arith.constant 0 : index
    %c0_3 = arith.constant 0 : index
    %9 = vector.load %arg3[%c0_1, %c0_2, %c0_3] : memref<8x64x128xf32, #tpu.memory_space<vmem>>, vector<1x64x128xf32>
    %10 = vector.shape_cast %9 : vector<1x64x128xf32> to vector<64x128xf32>
    %cst_4 = arith.constant dense<0.000000e+00> : vector<8x128xf32>
    %11 = tpu.matmul %8, %10, %cst_4 {dimension_numbers = #tpu.dot_dimension_numbers<[1], [0], [0], [1], [0, 0, 1, 1], [], []>} : vector<8x64xf32>, vector<64x128xf32>, vector<8x128xf32> -> vector<8x128xf32>
    %12 = arith.addf %7, %11 : vector<8x128xf32>
    %13 = vector.extract_strided_slice %6 {offsets = [1, 0], sizes = [8, 64], strides = [1, 1]} : vector<16x64xf32> to vector<8x64xf32>
    %c1 = arith.constant 1 : index
    %c0_5 = arith.constant 0 : index
    %c0_6 = arith.constant 0 : index
    %14 = vector.load %arg3[%c1, %c0_5, %c0_6] : memref<8x64x128xf32, #tpu.memory_space<vmem>>, vector<1x64x128xf32>
    %15 = vector.shape_cast %14 : vector<1x64x128xf32> to vector<64x128xf32>
    %cst_7 = arith.constant dense<0.000000e+00> : vector<8x128xf32>
    %16 = tpu.matmul %13, %15, %cst_7 {dimension_numbers = #tpu.dot_dimension_numbers<[1], [0], [0], [1], [0, 0, 1, 1], [], []>} : vector<8x64xf32>, vector<64x128xf32>, vector<8x128xf32> -> vector<8x128xf32>
    %17 = arith.addf %12, %16 : vector<8x128xf32>
    %18 = vector.extract_strided_slice %6 {offsets = [2, 0], sizes = [8, 64], strides = [1, 1]} : vector<16x64xf32> to vector<8x64xf32>
    %c2 = arith.constant 2 : index
    %c0_8 = arith.constant 0 : index
    %c0_9 = arith.constant 0 : index
    %19 = vector.load %arg3[%c2, %c0_8, %c0_9] : memref<8x64x128xf32, #tpu.memory_space<vmem>>, vector<1x64x128xf32>
    %20 = vector.shape_cast %19 : vector<1x64x128xf32> to vector<64x128xf32>
    %cst_10 = arith.constant dense<0.000000e+00> : vector<8x128xf32>
    %21 = tpu.matmul %18, %20, %cst_10 {dimension_numbers = #tpu.dot_dimension_numbers<[1], [0], [0], [1], [0, 0, 1, 1], [], []>} : vector<8x64xf32>, vector<64x128xf32>, vector<8x128xf32> -> vector<8x128xf32>
    %22 = arith.addf %17, %21 : vector<8x128xf32>
    %23 = vector.extract_strided_slice %6 {offsets = [3, 0], sizes = [8, 64], strides = [1, 1]} : vector<16x64xf32> to vector<8x64xf32>
    %c3 = arith.constant 3 : index
    %c0_11 = arith.constant 0 : index
    %c0_12 = arith.constant 0 : index
    %24 = vector.load %arg3[%c3, %c0_11, %c0_12] : memref<8x64x128xf32, #tpu.memory_space<vmem>>, vector<1x64x128xf32>
    %25 = vector.shape_cast %24 : vector<1x64x128xf32> to vector<64x128xf32>
    %cst_13 = arith.constant dense<0.000000e+00> : vector<8x128xf32>
    %26 = tpu.matmul %23, %25, %cst_13 {dimension_numbers = #tpu.dot_dimension_numbers<[1], [0], [0], [1], [0, 0, 1, 1], [], []>} : vector<8x64xf32>, vector<64x128xf32>, vector<8x128xf32> -> vector<8x128xf32>
    %27 = arith.addf %22, %26 : vector<8x128xf32>
    %28 = vector.extract_strided_slice %6 {offsets = [4, 0], sizes = [8, 64], strides = [1, 1]} : vector<16x64xf32> to vector<8x64xf32>
    %c4 = arith.constant 4 : index
    %c0_14 = arith.constant 0 : index
    %c0_15 = arith.constant 0 : index
    %29 = vector.load %arg3[%c4, %c0_14, %c0_15] : memref<8x64x128xf32, #tpu.memory_space<vmem>>, vector<1x64x128xf32>
    %30 = vector.shape_cast %29 : vector<1x64x128xf32> to vector<64x128xf32>
    %cst_16 = arith.constant dense<0.000000e+00> : vector<8x128xf32>
    %31 = tpu.matmul %28, %30, %cst_16 {dimension_numbers = #tpu.dot_dimension_numbers<[1], [0], [0], [1], [0, 0, 1, 1], [], []>} : vector<8x64xf32>, vector<64x128xf32>, vector<8x128xf32> -> vector<8x128xf32>
    %32 = arith.addf %27, %31 : vector<8x128xf32>
    %33 = vector.extract_strided_slice %6 {offsets = [5, 0], sizes = [8, 64], strides = [1, 1]} : vector<16x64xf32> to vector<8x64xf32>
    %c5 = arith.constant 5 : index
    %c0_17 = arith.constant 0 : index
    %c0_18 = arith.constant 0 : index
    %34 = vector.load %arg3[%c5, %c0_17, %c0_18] : memref<8x64x128xf32, #tpu.memory_space<vmem>>, vector<1x64x128xf32>
    %35 = vector.shape_cast %34 : vector<1x64x128xf32> to vector<64x128xf32>
    %cst_19 = arith.constant dense<0.000000e+00> : vector<8x128xf32>
    %36 = tpu.matmul %33, %35, %cst_19 {dimension_numbers = #tpu.dot_dimension_numbers<[1], [0], [0], [1], [0, 0, 1, 1], [], []>} : vector<8x64xf32>, vector<64x128xf32>, vector<8x128xf32> -> vector<8x128xf32>
    %37 = arith.addf %32, %36 : vector<8x128xf32>
    %38 = vector.extract_strided_slice %6 {offsets = [6, 0], sizes = [8, 64], strides = [1, 1]} : vector<16x64xf32> to vector<8x64xf32>
    %c6 = arith.constant 6 : index
    %c0_20 = arith.constant 0 : index
    %c0_21 = arith.constant 0 : index
    %39 = vector.load %arg3[%c6, %c0_20, %c0_21] : memref<8x64x128xf32, #tpu.memory_space<vmem>>, vector<1x64x128xf32>
    %40 = vector.shape_cast %39 : vector<1x64x128xf32> to vector<64x128xf32>
    %cst_22 = arith.constant dense<0.000000e+00> : vector<8x128xf32>
    %41 = tpu.matmul %38, %40, %cst_22 {dimension_numbers = #tpu.dot_dimension_numbers<[1], [0], [0], [1], [0, 0, 1, 1], [], []>} : vector<8x64xf32>, vector<64x128xf32>, vector<8x128xf32> -> vector<8x128xf32>
    %42 = arith.addf %37, %41 : vector<8x128xf32>
    %43 = vector.extract_strided_slice %6 {offsets = [7, 0], sizes = [8, 64], strides = [1, 1]} : vector<16x64xf32> to vector<8x64xf32>
    %c7 = arith.constant 7 : index
    %c0_23 = arith.constant 0 : index
    %c0_24 = arith.constant 0 : index
    %44 = vector.load %arg3[%c7, %c0_23, %c0_24] : memref<8x64x128xf32, #tpu.memory_space<vmem>>, vector<1x64x128xf32>
    %45 = vector.shape_cast %44 : vector<1x64x128xf32> to vector<64x128xf32>
    %cst_25 = arith.constant dense<0.000000e+00> : vector<8x128xf32>
    %46 = tpu.matmul %43, %45, %cst_25 {dimension_numbers = #tpu.dot_dimension_numbers<[1], [0], [0], [1], [0, 0, 1, 1], [], []>} : vector<8x64xf32>, vector<64x128xf32>, vector<8x128xf32> -> vector<8x128xf32>
    %47 = arith.addf %42, %46 : vector<8x128xf32>
    %c0_26 = arith.constant 0 : index
    %c0_27 = arith.constant 0 : index
    %48 = vector.load %arg4[%c0_26, %c0_27] : memref<1x128xf32, #tpu.memory_space<vmem>>, vector<1x128xf32>
    %49 = vector.broadcast %48 : vector<1x128xf32> to vector<8x128xf32>
    %50 = arith.addf %47, %49 : vector<8x128xf32>
    %cst_28 = arith.constant 0.000000e+00 : f32
    %cst_29 = arith.constant 6.000000e+00 : f32
    %51 = vector.broadcast %cst_28 : f32 to vector<8x128xf32>
    %52 = arith.maximumf %51, %50 : vector<8x128xf32>
    %53 = vector.broadcast %cst_29 : f32 to vector<8x128xf32>
    %54 = arith.minimumf %53, %52 : vector<8x128xf32>
    %c0_30 = arith.constant 0 : index
    %c0_31 = arith.constant 0 : index
    %55 = vector.load %arg5[%c0_30, %c0_31] : memref<128x128xf32, #tpu.memory_space<vmem>>, vector<128x128xf32>
    %cst_32 = arith.constant dense<0.000000e+00> : vector<8x128xf32>
    %56 = tpu.matmul %54, %55, %cst_32 {dimension_numbers = #tpu.dot_dimension_numbers<[1], [0], [0], [1], [0, 0, 1, 1], [], []>} : vector<8x128xf32>, vector<128x128xf32>, vector<8x128xf32> -> vector<8x128xf32>
    %c0_33 = arith.constant 0 : index
    %c0_34 = arith.constant 0 : index
    %57 = vector.load %arg6[%c0_33, %c0_34] : memref<1x128xf32, #tpu.memory_space<vmem>>, vector<1x128xf32>
    %58 = vector.broadcast %57 : vector<1x128xf32> to vector<8x128xf32>
    %59 = arith.addf %56, %58 : vector<8x128xf32>
    %c0_35 = arith.constant 0 : index
    %c0_36 = arith.constant 0 : index
    %c0_37 = arith.constant 0 : index
    %60 = vector.load %arg7[%c0_35, %c0_36, %c0_37] : memref<1x8x128xf32, #tpu.memory_space<vmem>>, vector<1x8x128xf32>
    %61 = vector.shape_cast %60 : vector<1x8x128xf32> to vector<8x128xf32>
    %62 = vector.shape_cast %59 : vector<8x128xf32> to vector<1x8x128xf32>
    tpu.vector_store %arg7[%c0_35, %c0_36, %c0_37], %62 {strides = array<i32>} : memref<1x8x128xf32, #tpu.memory_space<vmem>>, vector<1x8x128xf32>,
    return
  }
  func.func @transform_0(%arg0: i32, %arg1: i32) -> (i32, i32, i32) {
    %c0_i32 = arith.constant 0 : i32
    %c0_i32_0 = arith.constant 0 : i32
    %c0_i32_1 = arith.constant 0 : i32
    return %arg0, %c0_i32, %c0_i32_0 : i32, i32, i32
  }
  func.func @transform_1(%arg0: i32, %arg1: i32) -> (i32, i32, i32) {
    %c0_i32 = arith.constant 0 : i32
    %c0_i32_0 = arith.constant 0 : i32
    %c0_i32_1 = arith.constant 0 : i32
    %c0_i32_2 = arith.constant 0 : i32
    return %c0_i32, %c0_i32_0, %c0_i32_1 : i32, i32, i32
  }
  func.func @transform_2(%arg0: i32, %arg1: i32) -> (i32, i32) {
    %c0_i32 = arith.constant 0 : i32
    %c0_i32_0 = arith.constant 0 : i32
    %c0_i32_1 = arith.constant 0 : i32
    return %c0_i32, %c0_i32_0 : i32, i32
  }
  func.func @transform_3(%arg0: i32, %arg1: i32) -> (i32, i32) {
    %c0_i32 = arith.constant 0 : i32
    %c0_i32_0 = arith.constant 0 : i32
    %c0_i32_1 = arith.constant 0 : i32
    return %c0_i32, %c0_i32_0 : i32, i32
  }
  func.func @transform_4(%arg0: i32, %arg1: i32) -> (i32, i32) {
    %c0_i32 = arith.constant 0 : i32
    %c0_i32_0 = arith.constant 0 : i32
    %c0_i32_1 = arith.constant 0 : i32
    return %c0_i32, %c0_i32_0 : i32, i32
  }
  func.func @transform_5(%arg0: i32, %arg1: i32) -> (i32, i32, i32) {
    %c0_i32 = arith.constant 0 : i32
    %c0_i32_0 = arith.constant 0 : i32
    return %arg0, %arg1, %c0_i32 : i32, i32, i32
  }
}

module attributes {stable_mosaic.version = 11 : i64} {
  func.func @_multi_features_kernel(%arg0: i32, %arg1: i32, %arg2: memref<1x16x64xf32, #tpu.memory_space<vmem>>, %arg3: memref<8x64x128xf32, #tpu.memory_space<vmem>>, %arg4: memref<1x128xf32, #tpu.memory_space<vmem>>, %arg5: memref<128x128xf32, #tpu.memory_space<vmem>>, %arg6: memref<1x128xf32, #tpu.memory_space<vmem>>, %arg7: memref<1x8x128xf32, #tpu.memory_space<vmem>>) attributes {dimension_semantics = [#tpu.dimension_semantics<parallel>, #tpu.dimension_semantics<parallel>], iteration_bounds = array<i64: 2, 1>, scalar_prefetch = 0 : i64, scratch_operands = 0 : i64, tpu.core_type = #tpu.core_type<tc>, window_params = [{transform_indices = @transform_0, window_bounds = array<i64: 1, 16, 64>}, {pipeline_mode = #tpu.pipeline_mode<synchronous>, transform_indices = @transform_1, window_bounds = array<i64: 8, 64, 128>}, {pipeline_mode = #tpu.pipeline_mode<synchronous>, transform_indices = @transform_2, window_bounds = array<i64: 1, 128>}, {pipeline_mode = #tpu.pipeline_mode<synchronous>, transform_indices = @transform_3, window_bounds = array<i64: 128, 128>}, {pipeline_mode = #tpu.pipeline_mode<synchronous>, transform_indices = @transform_4, window_bounds = array<i64: 1, 128>}, {transform_indices = @transform_5, window_bounds = array<i64: 1, 8, 128>}]} {
    %c8_i32 = arith.constant 8 : i32
    %0 = arith.muli %arg1, %c8_i32 : i32
    %1 = tpu.assume_multiple %0, 8 : i32
    %c0_i32 = arith.constant 0 : i32
    %2 = arith.addi %1, %c0_i32 : i32
    %3 = tpu.assume_multiple %2, 8 : i32
    %c0 = arith.constant 0 : index
    %4 = arith.index_cast %3 : i32 to index
    %c0_0 = arith.constant 0 : index
    %5 = vector.load %arg2[%c0, %4, %c0_0] : memref<1x16x64xf32, #tpu.memory_space<vmem>>, vector<1x16x64xf32>
    %6 = vector.shape_cast %5 : vector<1x16x64xf32> to vector<16x64xf32>
    %cst = arith.constant 0.000000e+00 : f32
    %7 = vector.broadcast %cst : f32 to vector<8x128xf32>
    %8 = vector.extract_strided_slice %6 {offsets = [0, 0], sizes = [8, 64], strides = [1, 1]} : vector<16x64xf32> to vector<8x64xf32>
    %c0_1 = arith.constant 0 : index
    %c0_2 = arith.constant 0 : index
    %c0_3 = arith.constant 0 : index
    %9 = vector.load %arg3[%c0_1, %c0_2, %c0_3] : memref<8x64x128xf32, #tpu.memory_space<vmem>>, vector<1x64x128xf32>
    %10 = vector.shape_cast %9 : vector<1x64x128xf32> to vector<64x128xf32>
    %cst_4 = arith.constant dense<0.000000e+00> : vector<8x128xf32>
    %11 = tpu.matmul %8, %10, %cst_4 {dimension_numbers = #tpu.dot_dimension_numbers<[1], [0], [0], [1], [0, 0, 1, 1], [], []>} : vector<8x64xf32>, vector<64x128xf32>, vector<8x128xf32> -> vector<8x128xf32>
    %12 = arith.addf %7, %11 : vector<8x128xf32>
    %13 = vector.extract_strided_slice %6 {offsets = [1, 0], sizes = [8, 64], strides = [1, 1]} : vector<16x64xf32> to vector<8x64xf32>
    %c1 = arith.constant 1 : index
    %c0_5 = arith.constant 0 : index
    %c0_6 = arith.constant 0 : index
    %14 = vector.load %arg3[%c1, %c0_5, %c0_6] : memref<8x64x128xf32, #tpu.memory_space<vmem>>, vector<1x64x128xf32>
    %15 = vector.shape_cast %14 : vector<1x64x128xf32> to vector<64x128xf32>
    %cst_7 = arith.constant dense<0.000000e+00> : vector<8x128xf32>
    %16 = tpu.matmul %13, %15, %cst_7 {dimension_numbers = #tpu.dot_dimension_numbers<[1], [0], [0], [1], [0, 0, 1, 1], [], []>} : vector<8x64xf32>, vector<64x128xf32>, vector<8x128xf32> -> vector<8x128xf32>
    %17 = arith.addf %12, %16 : vector<8x128xf32>
    %18 = vector.extract_strided_slice %6 {offsets = [2, 0], sizes = [8, 64], strides = [1, 1]} : vector<16x64xf32> to vector<8x64xf32>
    %c2 = arith.constant 2 : index
    %c0_8 = arith.constant 0 : index
    %c0_9 = arith.constant 0 : index
    %19 = vector.load %arg3[%c2, %c0_8, %c0_9] : memref<8x64x128xf32, #tpu.memory_space<vmem>>, vector<1x64x128xf32>
    %20 = vector.shape_cast %19 : vector<1x64x128xf32> to vector<64x128xf32>
    %cst_10 = arith.constant dense<0.000000e+00> : vector<8x128xf32>
    %21 = tpu.matmul %18, %20, %cst_10 {dimension_numbers = #tpu.dot_dimension_numbers<[1], [0], [0], [1], [0, 0, 1, 1], [], []>} : vector<8x64xf32>, vector<64x128xf32>, vector<8x128xf32> -> vector<8x128xf32>
    %22 = arith.addf %17, %21 : vector<8x128xf32>
    %23 = vector.extract_strided_slice %6 {offsets = [3, 0], sizes = [8, 64], strides = [1, 1]} : vector<16x64xf32> to vector<8x64xf32>
    %c3 = arith.constant 3 : index
    %c0_11 = arith.constant 0 : index
    %c0_12 = arith.constant 0 : index
    %24 = vector.load %arg3[%c3, %c0_11, %c0_12] : memref<8x64x128xf32, #tpu.memory_space<vmem>>, vector<1x64x128xf32>
    %25 = vector.shape_cast %24 : vector<1x64x128xf32> to vector<64x128xf32>
    %cst_13 = arith.constant dense<0.000000e+00> : vector<8x128xf32>
    %26 = tpu.matmul %23, %25, %cst_13 {dimension_numbers = #tpu.dot_dimension_numbers<[1], [0], [0], [1], [0, 0, 1, 1], [], []>} : vector<8x64xf32>, vector<64x128xf32>, vector<8x128xf32> -> vector<8x128xf32>
    %27 = arith.addf %22, %26 : vector<8x128xf32>
    %28 = vector.extract_strided_slice %6 {offsets = [4, 0], sizes = [8, 64], strides = [1, 1]} : vector<16x64xf32> to vector<8x64xf32>
    %c4 = arith.constant 4 : index
    %c0_14 = arith.constant 0 : index
    %c0_15 = arith.constant 0 : index
    %29 = vector.load %arg3[%c4, %c0_14, %c0_15] : memref<8x64x128xf32, #tpu.memory_space<vmem>>, vector<1x64x128xf32>
    %30 = vector.shape_cast %29 : vector<1x64x128xf32> to vector<64x128xf32>
    %cst_16 = arith.constant dense<0.000000e+00> : vector<8x128xf32>
    %31 = tpu.matmul %28, %30, %cst_16 {dimension_numbers = #tpu.dot_dimension_numbers<[1], [0], [0], [1], [0, 0, 1, 1], [], []>} : vector<8x64xf32>, vector<64x128xf32>, vector<8x128xf32> -> vector<8x128xf32>
    %32 = arith.addf %27, %31 : vector<8x128xf32>
    %33 = vector.extract_strided_slice %6 {offsets = [5, 0], sizes = [8, 64], strides = [1, 1]} : vector<16x64xf32> to vector<8x64xf32>
    %c5 = arith.constant 5 : index
    %c0_17 = arith.constant 0 : index
    %c0_18 = arith.constant 0 : index
    %34 = vector.load %arg3[%c5, %c0_17, %c0_18] : memref<8x64x128xf32, #tpu.memory_space<vmem>>, vector<1x64x128xf32>
    %35 = vector.shape_cast %34 : vector<1x64x128xf32> to vector<64x128xf32>
    %cst_19 = arith.constant dense<0.000000e+00> : vector<8x128xf32>
    %36 = tpu.matmul %33, %35, %cst_19 {dimension_numbers = #tpu.dot_dimension_numbers<[1], [0], [0], [1], [0, 0, 1, 1], [], []>} : vector<8x64xf32>, vector<64x128xf32>, vector<8x128xf32> -> vector<8x128xf32>
    %37 = arith.addf %32, %36 : vector<8x128xf32>
    %38 = vector.extract_strided_slice %6 {offsets = [6, 0], sizes = [8, 64], strides = [1, 1]} : vector<16x64xf32> to vector<8x64xf32>
    %c6 = arith.constant 6 : index
    %c0_20 = arith.constant 0 : index
    %c0_21 = arith.constant 0 : index
    %39 = vector.load %arg3[%c6, %c0_20, %c0_21] : memref<8x64x128xf32, #tpu.memory_space<vmem>>, vector<1x64x128xf32>
    %40 = vector.shape_cast %39 : vector<1x64x128xf32> to vector<64x128xf32>
    %cst_22 = arith.constant dense<0.000000e+00> : vector<8x128xf32>
    %41 = tpu.matmul %38, %40, %cst_22 {dimension_numbers = #tpu.dot_dimension_numbers<[1], [0], [0], [1], [0, 0, 1, 1], [], []>} : vector<8x64xf32>, vector<64x128xf32>, vector<8x128xf32> -> vector<8x128xf32>
    %42 = arith.addf %37, %41 : vector<8x128xf32>
    %43 = vector.extract_strided_slice %6 {offsets = [7, 0], sizes = [8, 64], strides = [1, 1]} : vector<16x64xf32> to vector<8x64xf32>
    %c7 = arith.constant 7 : index
    %c0_23 = arith.constant 0 : index
    %c0_24 = arith.constant 0 : index
    %44 = vector.load %arg3[%c7, %c0_23, %c0_24] : memref<8x64x128xf32, #tpu.memory_space<vmem>>, vector<1x64x128xf32>
    %45 = vector.shape_cast %44 : vector<1x64x128xf32> to vector<64x128xf32>
    %cst_25 = arith.constant dense<0.000000e+00> : vector<8x128xf32>
    %46 = tpu.matmul %43, %45, %cst_25 {dimension_numbers = #tpu.dot_dimension_numbers<[1], [0], [0], [1], [0, 0, 1, 1], [], []>} : vector<8x64xf32>, vector<64x128xf32>, vector<8x128xf32> -> vector<8x128xf32>
    %47 = arith.addf %42, %46 : vector<8x128xf32>
    %c0_26 = arith.constant 0 : index
    %c0_27 = arith.constant 0 : index
    %48 = vector.load %arg4[%c0_26, %c0_27] : memref<1x128xf32, #tpu.memory_space<vmem>>, vector<1x128xf32>
    %49 = vector.broadcast %48 : vector<1x128xf32> to vector<8x128xf32>
    %50 = arith.addf %47, %49 : vector<8x128xf32>
    %cst_28 = arith.constant 0.000000e+00 : f32
    %cst_29 = arith.constant 6.000000e+00 : f32
    %51 = vector.broadcast %cst_28 : f32 to vector<8x128xf32>
    %52 = arith.maximumf %51, %50 : vector<8x128xf32>
    %53 = vector.broadcast %cst_29 : f32 to vector<8x128xf32>
    %54 = arith.minimumf %53, %52 : vector<8x128xf32>
    %c0_30 = arith.constant 0 : index
    %c0_31 = arith.constant 0 : index
    %55 = vector.load %arg5[%c0_30, %c0_31] : memref<128x128xf32, #tpu.memory_space<vmem>>, vector<128x128xf32>
    %cst_32 = arith.constant dense<0.000000e+00> : vector<8x128xf32>
    %56 = tpu.matmul %54, %55, %cst_32 {dimension_numbers = #tpu.dot_dimension_numbers<[1], [0], [0], [1], [0, 0, 1, 1], [], []>} : vector<8x128xf32>, vector<128x128xf32>, vector<8x128xf32> -> vector<8x128xf32>
    %c0_33 = arith.constant 0 : index
    %c0_34 = arith.constant 0 : index
    %57 = vector.load %arg6[%c0_33, %c0_34] : memref<1x128xf32, #tpu.memory_space<vmem>>, vector<1x128xf32>
    %58 = vector.broadcast %57 : vector<1x128xf32> to vector<8x128xf32>
    %59 = arith.addf %56, %58 : vector<8x128xf32>
    %c0_35 = arith.constant 0 : index
    %c0_36 = arith.constant 0 : index
    %c0_37 = arith.constant 0 : index
    %60 = vector.load %arg7[%c0_35, %c0_36, %c0_37] : memref<1x8x128xf32, #tpu.memory_space<vmem>>, vector<1x8x128xf32>
    %61 = vector.shape_cast %60 : vector<1x8x128xf32> to vector<8x128xf32>
    %62 = vector.shape_cast %59 : vector<8x128xf32> to vector<1x8x128xf32>
    tpu.vector_store %arg7[%c0_35, %c0_36, %c0_37], %62 {strides = array<i32>} : memref<1x8x128xf32, #tpu.memory_space<vmem>>, vector<1x8x128xf32>,
    return
  }
  func.func @transform_0(%arg0: i32, %arg1: i32) -> (i32, i32, i32) {
    %c0_i32 = arith.constant 0 : i32
    %c0_i32_0 = arith.constant 0 : i32
    %c0_i32_1 = arith.constant 0 : i32
    return %arg0, %c0_i32, %c0_i32_0 : i32, i32, i32
  }
  func.func @transform_1(%arg0: i32, %arg1: i32) -> (i32, i32, i32) {
    %c0_i32 = arith.constant 0 : i32
    %c0_i32_0 = arith.constant 0 : i32
    %c0_i32_1 = arith.constant 0 : i32
    %c0_i32_2 = arith.constant 0 : i32
    return %c0_i32, %c0_i32_0, %c0_i32_1 : i32, i32, i32
  }
  func.func @transform_2(%arg0: i32, %arg1: i32) -> (i32, i32) {
    %c0_i32 = arith.constant 0 : i32
    %c0_i32_0 = arith.constant 0 : i32
    %c0_i32_1 = arith.constant 0 : i32
    return %c0_i32, %c0_i32_0 : i32, i32
  }
  func.func @transform_3(%arg0: i32, %arg1: i32) -> (i32, i32) {
    %c0_i32 = arith.constant 0 : i32
    %c0_i32_0 = arith.constant 0 : i32
    %c0_i32_1 = arith.constant 0 : i32
    return %c0_i32, %c0_i32_0 : i32, i32
  }
  func.func @transform_4(%arg0: i32, %arg1: i32) -> (i32, i32) {
    %c0_i32 = arith.constant 0 : i32
    %c0_i32_0 = arith.constant 0 : i32
    %c0_i32_1 = arith.constant 0 : i32
    return %c0_i32, %c0_i32_0 : i32, i32
  }
  func.func @transform_5(%arg0: i32, %arg1: i32) -> (i32, i32, i32) {
    %c0_i32 = arith.constant 0 : i32
    %c0_i32_0 = arith.constant 0 : i32
    return %arg0, %arg1, %c0_i32 : i32, i32, i32
  }
}

</mosaic_0001>

<bundles_post_ra>
// kernel: tpu_custom_call.1
= control target key start
LH: loop header
LB: loop body
LE: loop exit
PB: predicated region body
PF: predicated region fallthrough
CT: control target
= control target key end

     0   :  { %s1266_s0 = inlined_call_operand.hbm [shape: f32[2,16,64], index: 0, kind: input, shape index: {}]   ;;  %s1267_s1 = inlined_call_operand.hbm [shape: f32[8,64,128], index: 1, kind: input, shape index: {}]   ;;  %s1268_s2 = inlined_call_operand.vmem [shape: f32[1,128], index: 2, kind: input, shape index: {}]   ;;  %s1269_s3 = inlined_call_operand.hbm [shape: f32[128,128], index: 3, kind: input, shape index: {}]   ;;  %s1270_s4 = inlined_call_operand.vmem [shape: f32[1,128], index: 4, kind: input, shape index: {}]   ;;  %s1271_s5 = inlined_call_operand.hbm [shape: f32[2,8,128], index: 5, kind: output, shape index: {}]  }
   0x1   :  { %1274 = sst [smem:[#allocation12_spill]] %s1267_s1 }
   0x2   :  { %1275 = sst [smem:[#allocation13_spill]] %s1269_s3 }
   0x3   :  { %10 = vsyncpa [#allocation3], 0 }
   0x4   :  { %12 = vsyncpa [#allocation3 + $0x1], 0 }
   0x5   :  { %13 = vsyncpa [#allocation6], 0 }
   0x6   :  { %14 = vsyncpa [#allocation4], 0 }
   0x7   :  { %16 = vsyncpa [#allocation4 + $0x1], 0  ;;  %s1071_s18 = smov 0   ;;  %s1073_s19 = smov 0  }
   0x8   :  { %s1075_s20 = smov 0   ;;  %s1077_s21 = smov 0  }
   0x9   :  { %s1079_s22 = smov 0   ;;  %s1081_s23 = smov 0  }
   0xa LB: > { %s745_s24 = sadd.s32 4294967295, %s1035_s23   ;;  %s746_s25 = sadd.s32 4294967294, %s1035_s23   ;;  %s1035_s23 = sphi %s1081_s23, %s22_s23   ;;  %s1031_s22 = sphi %s1079_s22, %s1289_s22   ;;  %s1027_s21 = sphi %s1077_s21, %s1288_s21   ;;  %s1023_s20 = sphi %s1075_s20, %s1287_s20   ;;  %s1019_s19 = sphi %s1073_s19, %s1286_s19   ;;  %s1015_s18 = sphi %s1071_s18, %s1285_s18  }
   0xb   : > { %p54_p0 = scmp.ne.s32.totalorder %s1019_s19, %s1015_s18  ;;  %p1107_p1 = scmp.eq.s32.totalorder %s745_s24, 0 }
   0xc   : > { %p170_p2 = scmp.eq.s32.totalorder %s746_s25, 1  ;;  %p747_p4 = scmp.ge.s32.totalorder %s1035_s23, 1 }
   0xd   : > { %p1113_p3 = por %p1107_p1, %p54_p0  ;;  %p177_p6 = scmp.lt.s32.totalorder %s1035_s23, 3 }
   0xe   : > { %p1118_p5 = por %p170_p2, %p54_p0  ;;  %s1279_s1 = sld [smem:[#allocation12_spill]] }
   0xf   : > { %p1126_p7 = pnand %p747_p4, %p177_p6  ;;  %s1037_s8 = smov [#allocation5]  }
  0x10   : > { %s190_s9 = sshll.u32 %s1037_s8, 4  ;;  %p750_p10 = scmp.ge.s32.totalorder %s1035_s23, 2  ;;  %s191_s9 = int_to_ptr.vmem [resolvable:$true] %s190_s9 }
  0x11   : > { %p784_p8 = pneg %p1126_p7  ;;  %s1281_s3 = sld [smem:[#allocation13_spill]] }
  0x12   : > { %s1272_s13 = smov 128   ;;  %s1273_s14 = smov 8  }
  0x13   : > { %p785_p9 = pnand %p784_p8, %p1107_p1  ;;  %s1040_s15 = smov [#allocation7]  }
  0x14   : > { %s188_s6 = sshll.u32 %s1279_s1, 4  ;;  %s207_s16 = sshll.u32 %s1040_s15, 4  ;;  %s189_s6 = int_to_ptr.hbm [resolvable:$true] %s188_s6  ;;  %s208_s16 = int_to_ptr.vmem [resolvable:$true] %s207_s16 }
  0x15   : > { %787 = dma.hbm_to_vmem [thread:$0]  (!%p785_p9), %s189_s6, 8192, %s191_s9, [#allocation6], %s1272_s13, %s1272_s13, %s1273_s14  }
  0x16   : > { %p164_p11 = scmp.eq.s32.totalorder %s745_s24, 1  ;;  %s34_s17 = sadd.s32 1, %s1031_s22 }
  0x17   : > { %s205_s12 = sshll.u32 %s1281_s3, 4  ;;  %p36_p12 = scmp.ge.s32.totalorder %s34_s17, 2  ;;  %s206_s12 = int_to_ptr.hbm [resolvable:$true] %s205_s12 }
  0x18   : > { %790 = dma.hbm_to_vmem [thread:$0]  (!%p785_p9), %s206_s12, 2048, %s208_s16, [#allocation6], %s1272_s13, %s1272_s13, %s1273_s14  }
  0x19   : > { %s41_s25 = sadd.s32 1, %s1023_s20  ;;  %p48_p13 = scmp.ne.s32.totalorder %s1023_s20, %s1019_s19 }
  0x1a   : > { %p49_p0 = scmp.eq.s32.totalorder %s1035_s23, 0  ;;  %s1291_s17 = smov (%p36_p12, %s34_s17), 0 }
  0x1b   : > { %p1153_p2 = por %p164_p11, %p48_p13  ;;  %p801_p4 = scmp.lt.s32.totalorder %s1035_s23, 2 }
  0x1c   : > { %s38_s30 = ssub.s32 %s1031_s22, %s1291_s17  ;;  %s224_s6 = sand.u32 1, %s1023_s20  }
  0x1d   : > { %p39_p6 = scmp.eq.s32.totalorder %s38_s30, 0  ;;  %p50_p8 = por %p49_p0, %p48_p13 }
  0x1e   : > { %s751_s8 = sshll.u32 %s224_s6, 4  ;;  %s771_s24 = sshll.u32 %s1031_s22, 4 }
  0x1f   : > { %s1163_s9 = scalar_select %p39_p6, %s1023_s20, %s41_s25  }
  0x20   : > { %s233_s12 = scalar_lea.hbm %s1266_s0, %s771_s24  ;;  %s228_s16 = scalar_lea.vmem [#allocation2], %s751_s8 }
  0x21   : > { %s234_s15 = sshll.u32 %s233_s12, 4  ;;  %s236_s13 = sshll.u32 %s228_s16, 4  ;;  %s235_s15 = int_to_ptr.hbm [resolvable:$true] %s234_s15  ;;  %s237_s13 = int_to_ptr.vmem [resolvable:$true] %s236_s13 }
  0x22   : > { %p792_p9 = pnand %p801_p4, %p50_p8  ;;  %s225_s14 = scalar_lea.sflag [#allocation3], %s224_s6 }
  0x23   : > { %s1283_s1 = smov 8   ;;  %s1284_s3 = smov 128  }
  0x24   : > { %794 = dma.hbm_to_vmem [thread:$0]  (!%p792_p9), %s235_s15, 256, %s237_s13, %s225_s14, %s1284_s3, %s1284_s3, %s1283_s1  }
  0x25   : > { %248 = sbr.rel (%p1126_p7) target bundleno = 362 (0x16a), region = 40  ;;  %s1176_s25 = sand.u32 (!%p1126_p7), 1, %s1019_s19  }
  0x26   : > { %s755_s30 = sshll.u32 (!%p1126_p7), %s1176_s25, 4  ;;  %s251_s8 = scalar_lea.sflag (!%p1126_p7), [#allocation3], %s1176_s25 }
  0x27   : > { %s1180_s24 = scalar_lea.vmem (!%p1126_p7), [#allocation2], %s755_s30 }
  0x2a   : > { %1002 = dma.done.wait (%p1113_p3), %s251_s8, 256  }
  0x2b   : > { %1004 = vsyncadd (%p1113_p3), %s251_s8, 4294967040 }
  0x2c   : > { %1006 = dma.done.wait (%p1107_p1), [#allocation6], 10240  }
  0x2d   : > { %1008 = vsyncadd (%p1107_p1), [#allocation6], 4294957056  ;;  %v312_v0 = vld [vmem:[#allocation5 + $0x78] sm:$0xff]  ;;  %v311_v1 = vld [vmem:[#allocation5 + $0x70] sm:$0xff]  ;;  %vm315_vm0 = vcmask 1046528   ;;  %vm373_vm1 = vcmask 1045504  }
  0x2e   : > { %330 = vmatpush.msra.mxu1 %v312_v0  ;;  %v310_v2 = vld [vmem:[#allocation5 + $0x68] sm:$0xff]  ;;  %v372_v3 = vld [vmem:[#allocation5 + $0xb8] sm:$0xff]  ;;  %v371_v4 = vld [vmem:[#allocation5 + $0xb0] sm:$0xff]  ;;  %vm319_vm2 = vcmask 523264   ;;  %vm409_vm3 = vcmask 1044480   ;;  %vm445_vm4 = vcmask 1043456  }
  0x2f   : > { %387 = vmatpush.msra.mxu2 %v372_v3  ;;  %v408_v5 = vld [vmem:[#allocation5 + $0xf8] sm:$0xff]  ;;  %v309_v6 = vld [vmem:[#allocation5 + $0x60] sm:$0xff]  ;;  %v370_v7 = vld [vmem:[#allocation5 + $0xa8] sm:$0xff]  ;;  %vm517_vm5 = vcmask 1041408   ;;  %vm553_vm6 = vcmask 1040384   ;;  %vm481_vm7 = vcmask 1042432  }
  0x30   : > { %331 = vmatpush.msra.mxu1 %v311_v1  ;;  %423 = vmatpush.msra.mxu3 %v408_v5  ;;  %v407_v8 = vld [vmem:[#allocation5 + $0xf0] sm:$0xff]  ;;  %v406_v9 = vld [vmem:[#allocation5 + $0xe8] sm:$0xff]  ;;  %v308_v10 = vld [vmem:[#allocation5 + $0x58] sm:$0xff]  ;;  %s758_s26 = sshll.u32 %s1176_s25, 3  ;;  %s768_s27 = sshll.u32 %s1027_s21, 3 }
  0x31   : > { %388 = vmatpush.msra.mxu2 %v371_v4  ;;  %v369_v11 = vld [vmem:[#allocation5 + $0xa0] sm:$0xff]  ;;  %v307_v12 = vld [vmem:[#allocation5 + $0x50] sm:$0xff]  ;;  %v444_v14 = vld [vmem:[#allocation5 + $0x138] sm:$0xff]  ;;  %s640_s14 = scalar_lea.hbm %s1271_s5, %s768_s27  ;;  %s291_s11 = scalar_lea.vmem [#allocation8], %s758_s26 }
  0x32   : > { %332 = vmatpush.msra.mxu1 %v310_v2  ;;  %424 = vmatpush.msra.mxu3 %v407_v8  ;;  %v405_v13 = vld [vmem:[#allocation5 + $0xe0] sm:$0xff]  ;;  %v368_v15 = vld [vmem:[#allocation5 + $0x98] sm:$0xff]  ;;  %v443_v19 = vld [vmem:[#allocation5 + $0x130] sm:$0xff]  ;;  %s642_s12 = sshll.u32 %s291_s11, 4  ;;  %s644_s15 = sshll.u32 %s640_s14, 4  ;;  %s643_s12 = int_to_ptr.vmem [resolvable:$true] %s642_s12  ;;  %s645_s15 = int_to_ptr.hbm [resolvable:$true] %s644_s15 }
  0x33   : > { %389 = vmatpush.msra.mxu2 %v370_v7  ;;  %459 = vmatpush.msra.mxu0 %v444_v14  ;;  %v1191_v16 = vld [vmem:[%s1180_s24] sm:$0xff]  ;;  %v1194_v17 = vld [vmem:[%s1180_s24 + $0x8] sm:$0xff]  ;;  %s629_s16 = scalar_lea.sflag [#allocation4], %s1176_s25  ;;  %s963_s30 = sshra.s32 %s645_s15, 4  ;;  %s964_s30 = int_to_ptr.hbm [resolvable:$true] %s963_s30 }
  0x34   : > { %333 = vmatpush.msra.mxu1 %v309_v6  ;;  %425 = vmatpush.msra.mxu3 %v406_v9  ;;  %v404_v18 = vld [vmem:[#allocation5 + $0xd8] sm:$0xff]  ;;  %v306_v20 = vld [vmem:[#allocation5 + $0x48] sm:$0xff]  ;;  %v367_v21 = vld [vmem:[#allocation5 + $0x90] sm:$0xff]  ;;  %v316_v22 = vrot.slane %v1191_v16, 1  ;;  %v317_v23 = vrot.slane %v1194_v17, 1  ;;  %v374_v26 = vrot.slane %v1191_v16, 2  ;;  %p970_p11 = scmp.lt.s32.totalorder %s964_s30, %s1271_s5 }
  0x35   : > { %390 = vmatpush.msra.mxu2 %v369_v11  ;;  %460 = vmatpush.msra.mxu0 %v443_v19  ;;  %v403_v24 = vld [vmem:[#allocation5 + $0xd0] sm:$0xff]  ;;  %v442_v25 = vld [vmem:[#allocation5 + $0x128] sm:$0xff]  ;;  %v375_v27 = vrot.slane %v1194_v17, 2  ;;  %v305_v28 = vld [vmem:[#allocation5 + $0x40] sm:$0xff]  ;;  %v410_v33 = vrot.slane %v1191_v16, 3  ;;  %v411_v34 = vrot.slane %v1194_v17, 3 }
  0x36   : > { %334 = vmatpush.msra.mxu1 %v308_v10  ;;  %426 = vmatpush.msra.mxu3 %v405_v13  ;;  %v366_v29 = vld [vmem:[#allocation5 + $0x88] sm:$0xff]  ;;  %v441_v30 = vld [vmem:[#allocation5 + $0x120] sm:$0xff]  ;;  %v303_v31 = vld [vmem:[#allocation5 + $0x38] sm:$0xff]  ;;  %v318_v35 = vsel %vm315_vm0, %v316_v22, %v317_v23  ;;  %v446_v52 = vrot.slane %v1191_v16, 4  ;;  %v447_v54 = vrot.slane %v1194_v17, 4  ;;  %v518_v2 = vrot.slane %v1191_v16, 6 }
  0x37   : > { %391 = vmatpush.msra.mxu2 %v368_v15  ;;  %461 = vmatpush.msra.mxu0 %v442_v25  ;;  %v402_v32 = vld [vmem:[#allocation5 + $0xc8] sm:$0xff]  ;;  %v365_v36 = vld [vmem:[#allocation5 + $0x80] sm:$0xff]  ;;  %v302_v37 = vld [vmem:[#allocation5 + $0x30] sm:$0xff]  ;;  %v376_v38 = vsel %vm373_vm1, %v374_v26, %v375_v27  ;;  %v412_v42 = vsel %vm409_vm3, %v410_v33, %v411_v34  ;;  %v519_v3 = vrot.slane %v1194_v17, 6  ;;  %v554_v7 = vrot.slane %v1191_v16, 7  ;;  %s965_s21 = scalar_lea.hbm %s964_s30, 8 }
  0x38   : > { %335 = vmatpush.msra.mxu1 %v307_v12  ;;  %427 = vmatpush.msra.mxu3 %v404_v18  ;;  %v516_v39 = vld [vmem:[#allocation5 + $0x1b8] sm:$0xff]  ;;  %v401_v40 = vld [vmem:[#allocation5 + $0xc0] sm:$0xff]  ;;  %v301_v41 = vld [vmem:[#allocation5 + $0x28] sm:$0xff]  ;;  %v448_v61 = vsel %vm445_vm4, %v446_v52, %v447_v54  ;;  %v555_v8 = vrot.slane %v1194_v17, 7  ;;  %p966_p1 = scmp.ne.s32.totalorder %s964_s30, %s965_s21  ;;  %s969_s1 = scalar_lea.hbm %s1271_s5, 16 }
  0x39   : > { %392 = vmatpush.msra.mxu2 %v367_v21  ;;  %462 = vmatpush.msra.mxu0 %v441_v30  ;;  %v515_v43 = vld [vmem:[#allocation5 + $0x1b0] sm:$0xff]  ;;  %v552_v44 = vld [vmem:[#allocation5 + $0x1f8] sm:$0xff]  ;;  %v300_v45 = vld [vmem:[#allocation5 + $0x20] sm:$0xff]  ;;  %v520_v11 = vsel %vm517_vm5, %v518_v2, %v519_v3  ;;  %v483_v21 = vrot.slane %v1194_v17, 5  ;;  %p971_p12 = scmp.lt.s32.totalorder %s969_s1, %s965_s21 }
  0x3a   : > { %336 = vmatpush.msra.mxu1 %v306_v20  ;;  %428 = vmatpush.msra.mxu3 %v403_v24  ;;  %v440_v46 = vld [vmem:[#allocation5 + $0x118] sm:$0xff]  ;;  %v514_v47 = vld [vmem:[#allocation5 + $0x1a8] sm:$0xff]  ;;  %v551_v48 = vld [vmem:[#allocation5 + $0x1f0] sm:$0xff]  ;;  %v556_v14 = vsel %vm553_vm6, %v554_v7, %v555_v8  ;;  %v482_v20 = vrot.slane %v1191_v16, 5  ;;  %p967_p3 = pnand %p966_p1, %p1153_p2 }
  0x3b   : > { %393 = vmatpush.msra.mxu2 %v366_v29  ;;  %v299_v49 = vld [vmem:[#allocation5 + $0x18] sm:$0xff]  ;;  %v439_v50 = vld [vmem:[#allocation5 + $0x110] sm:$0xff]  ;;  %v513_v51 = vld [vmem:[#allocation5 + $0x1a0] sm:$0xff]  ;;  %463 = vmatpush.msra.mxu0 %v440_v46  ;;  %p972_p13 = por %p971_p12, %p970_p11 }
  0x3c   : > { %337 = vmatpush.msra.mxu1 %v305_v28  ;;  %429 = vmatpush.msra.mxu3 %v402_v32  ;;  %v550_v53 = vld [vmem:[#allocation5 + $0x1e8] sm:$0xff]  ;;  %v298_v55 = vld [vmem:[#allocation5 + $0x10] sm:$0xff]  ;;  %v512_v57 = vld [vmem:[#allocation5 + $0x198] sm:$0xff]  ;;  %v484_v24 = vsel %vm481_vm7, %v482_v20, %v483_v21  ;;  %p968_p7 = pneg %p967_p3 }
  0x3d   : > { %759 = vmatmul.msk.f32.vlgmr.msra.gmra.mxu1 %vm319_vm2, %v318_v35  ;;  %394 = vmatpush.msra.mxu2 %v365_v36  ;;  %v438_v56 = vld [vmem:[#allocation5 + $0x108] sm:$0xff]  ;;  %v549_v58 = vld [vmem:[#allocation5 + $0x1e0] sm:$0xff]  ;;  %v511_v62 = vld [vmem:[#allocation5 + $0x190] sm:$0xff] }
  0x3e   : > { %352 = vmatpush.msrb.mxu1 %v303_v31  ;;  %761 = vmatmul.msk.f32.vlgmr.msra.gmra.mxu2 %vm319_vm2, %v376_v38  ;;  %v297_v59 = vld [vmem:[#allocation5 + $0x8] sm:$0xff]  ;;  %v437_v60 = vld [vmem:[#allocation5 + $0x100] sm:$0xff]  ;;  %v548_v0 = vld [vmem:[#allocation5 + $0x1d8] sm:$0xff]  ;;  %p973_p0 = pnand %p972_p13, %p968_p7 }
  0x3f   : > { %531 = vmatpush.msrb.mxu2 %v516_v39  ;;  %430 = vmatpush.msra.mxu3 %v401_v40  ;;  %v296_v63 = vld [vmem:[#allocation5] sm:$0xff]  ;;  %v510_v1 = vld [vmem:[#allocation5 + $0x188] sm:$0xff]  ;;  %v480_v4 = vld [vmem:[#allocation5 + $0x178] sm:$0xff] }
  0x40   : > { %353 = vmatpush.msrb.mxu1 %v302_v37  ;;  %762 = vmatmul.msk.f32.vlgmr.msra.gmra.mxu3 %vm319_vm2, %v412_v42  ;;  %v547_v5 = vld [vmem:[#allocation5 + $0x1d0] sm:$0xff]  ;;  %v509_v6 = vld [vmem:[#allocation5 + $0x180] sm:$0xff]  ;;  %v546_v10 = vld [vmem:[#allocation5 + $0x1c8] sm:$0xff] }
  0x41   : > { %532 = vmatpush.msrb.mxu2 %v515_v43  ;;  %567 = vmatpush.msrb.mxu3 %v552_v44  ;;  %v479_v9 = vld [vmem:[#allocation5 + $0x170] sm:$0xff]  ;;  %v478_v12 = vld [vmem:[#allocation5 + $0x168] sm:$0xff]  ;;  %v545_v13 = vld [vmem:[#allocation5 + $0x1c0] sm:$0xff] }
  0x42   : > { %354 = vmatpush.msrb.mxu1 %v301_v41  ;;  %464 = vmatpush.msra.mxu0 %v439_v50  ;;  %v477_v15 = vld [vmem:[#allocation5 + $0x160] sm:$0xff]  ;;  %v476_v18 = vld [vmem:[#allocation5 + $0x158] sm:$0xff]  ;;  %v475_v19 = vld [vmem:[#allocation5 + $0x150] sm:$0xff] }
  0x43   : > { %533 = vmatpush.msrb.mxu2 %v514_v47  ;;  %568 = vmatpush.msrb.mxu3 %v551_v48  ;;  %v474_v22 = vld [vmem:[#allocation5 + $0x148] sm:$0xff]  ;;  %v473_v23 = vld [vmem:[#allocation5 + $0x140] sm:$0xff]  ;;  %v602_v25 = vld [vmem:[#allocation7 + $0x78] sm:$0xff] }
  0x44   : > { %355 = vmatpush.msrb.mxu1 %v300_v45  ;;  %465 = vmatpush.msra.mxu0 %v438_v56  ;;  %v601_v26 = vld [vmem:[#allocation7 + $0x70] sm:$0xff]  ;;  %v600_v27 = vld [vmem:[#allocation7 + $0x68] sm:$0xff]  ;;  %v599_v28 = vld [vmem:[#allocation7 + $0x60] sm:$0xff] }
  0x45   : > { %534 = vmatpush.msrb.mxu2 %v513_v51  ;;  %569 = vmatpush.msrb.mxu3 %v550_v53  ;;  %v597_v17 = vld [vmem:[#allocation7 + $0x50] sm:$0xff]  ;;  %v596_v29 = vld [vmem:[#allocation7 + $0x48] sm:$0xff]  ;;  %v595_v30 = vld [vmem:[#allocation7 + $0x40] sm:$0xff] }
  0x46   : > { %356 = vmatpush.msrb.mxu1 %v299_v49  ;;  %466 = vmatpush.msra.mxu0 %v437_v60  ;;  %v594_v31 = vld [vmem:[#allocation7 + $0x38] sm:$0xff]  ;;  %v593_v32 = vld [vmem:[#allocation7 + $0x30] sm:$0xff]  ;;  %v592_v33 = vld [vmem:[#allocation7 + $0x28] sm:$0xff] }
  0x47   : > { %535 = vmatpush.msrb.mxu2 %v512_v57  ;;  %570 = vmatpush.msrb.mxu3 %v549_v58  ;;  %v591_v34 = vld [vmem:[#allocation7 + $0x20] sm:$0xff]  ;;  %v590_v35 = vld [vmem:[#allocation7 + $0x18] sm:$0xff]  ;;  %v589_v37 = vld [vmem:[#allocation7 + $0x10] sm:$0xff] }
  0x48   : > { %357 = vmatpush.msrb.mxu1 %v298_v55  ;;  %763 = vmatmul.msk.f32.vlgmr.msra.gmra.mxu0 %vm319_vm2, %v448_v61  ;;  %v588_v38 = vld [vmem:[#allocation7 + $0x8] sm:$0xff]  ;;  %v587_v39 = vld [vmem:[#allocation7] sm:$0xff] }
  0x49   : > { %536 = vmatpush.msrb.mxu2 %v511_v62  ;;  %571 = vmatpush.msrb.mxu3 %v548_v0  ;;  %v857_v53 = vld [vmem:[%s1268_s2] ss:$0 sm:$0xff] }
  0x4a   : > { %358 = vmatpush.msrb.mxu1 %v297_v59  ;;  %607 = vmatpush.msrb.mxu0 %v602_v25  ;;  %v858_v58 = vld [vmem:[%s1270_s4] ss:$0 sm:$0xff] }
  0x4b   : > { %537 = vmatpush.msrb.mxu2 %v510_v1  ;;  %572 = vmatpush.msrb.mxu3 %v547_v5 }
  0x4c   : > { %359 = vmatpush.msrb.mxu1 %v296_v63  ;;  %608 = vmatpush.msrb.mxu0 %v601_v26 }
  0x4d   : > { %760 = vmatmul.msk.f32.vlgmr.msrb.gmra.mxu1 %vm319_vm2, %v1191_v16  ;;  %538 = vmatpush.msrb.mxu2 %v509_v6  ;;  %v598_v16 = vld [vmem:[#allocation7 + $0x58] sm:$0xff] }
  0x4e   : > { %495 = vmatpush.msra.mxu1 %v480_v4  ;;  %573 = vmatpush.msrb.mxu3 %v546_v10 }
  0x4f   : > { %765 = vmatmul.msk.f32.vlgmr.msrb.gmra.mxu2 %vm319_vm2, %v520_v11  ;;  %609 = vmatpush.msrb.mxu0 %v600_v27 }
  0x50   : > { %496 = vmatpush.msra.mxu1 %v479_v9  ;;  %574 = vmatpush.msrb.mxu3 %v545_v13 }
  0x51   : > { %766 = vmatmul.msk.f32.vlgmr.msrb.gmra.mxu3 %vm319_vm2, %v556_v14  ;;  %610 = vmatpush.msrb.mxu0 %v599_v28 }
  0x52   : > { %497 = vmatpush.msra.mxu1 %v478_v12 }
  0x53   : > { %611 = vmatpush.msrb.mxu0 %v598_v16 }
  0x54   : > { %498 = vmatpush.msra.mxu1 %v477_v15 }
  0x55   : > { %612 = vmatpush.msrb.mxu0 %v597_v17 }
  0x56   : > { %499 = vmatpush.msra.mxu1 %v476_v18 }
  0x57   : > { %613 = vmatpush.msrb.mxu0 %v596_v29 }
  0x58   : > { %500 = vmatpush.msra.mxu1 %v475_v19 }
  0x59   : > { %614 = vmatpush.msrb.mxu0 %v595_v30 }
  0x5a   : > { %501 = vmatpush.msra.mxu1 %v474_v22 }
  0x5b   : > { %615 = vmatpush.msrb.mxu0 %v594_v31 }
  0x5c   : > { %502 = vmatpush.msra.mxu1 %v473_v23 }
  0x5d   : > { %764 = vmatmul.msk.f32.vlgmr.msra.gmra.mxu1 %vm319_vm2, %v484_v24  ;;  %616 = vmatpush.msrb.mxu0 %v593_v32 }
  0x5f   : > { %617 = vmatpush.msrb.mxu0 %v592_v33 }
  0x61   : > { %618 = vmatpush.msrb.mxu0 %v591_v34 }
  0x63   : > { %619 = vmatpush.msrb.mxu0 %v590_v35 }
  0x65   : > { %620 = vmatpush.msrb.mxu0 %v589_v37 }
  0x67   : > { %621 = vmatpush.msrb.mxu0 %v588_v38 }
  0x69   : > { %622 = vmatpush.msrb.mxu0 %v587_v39 }
  0xba   : > { %v339_v36 = vpop.f32.mrf.mxu1 }
  0xc1   : > { %v396_v42 = vpop.f32.mrf.mxu2 }
  0xc3   : > { %v432_v44 = vpop.f32.mrf.mxu3 }
  0xc5   : > { %v468_v46 = vpop.f32.mrf.mxu0 }
  0xca   : > { %v361_v40 = vpop.f32.mrf.mxu1 }
  0xcb   : > { %v362_v41 = vadd.f32 %v361_v40, %v339_v36 }
  0xcd   : > { %v399_v43 = vadd.f32 %v396_v42, %v362_v41 }
  0xcf   : > { %v435_v45 = vadd.f32 %v432_v44, %v399_v43 }
  0xd1   : > { %v471_v47 = vadd.f32 %v468_v46, %v435_v45 }
  0xd2   : > { %v540_v49 = vpop.f32.mrf.mxu2 }
  0xd4   : > { %v576_v51 = vpop.f32.mrf.mxu3 }
  0xda   : > { %v504_v48 = vpop.f32.mrf.mxu1 }
  0xdb   : > { %v507_v50 = vadd.f32 %v504_v48, %v471_v47 }
  0xdd   : > { %v543_v52 = vadd.f32 %v540_v49, %v507_v50 }
  0xdf   : > { %v579_v54 = vadd.f32 %v576_v51, %v543_v52 }
  0xe1   : > { %v584_v55 = vadd.f32 %v857_v53, %v579_v54 }
  0xe3   : > { %v585_v56 = vmax.f32 %v584_v55, 0.0 }
  0xe5   : > { %v586_v57 = vmin.f32 %v585_v56, 6.0 }
  0xe7   : > { %623 = vmatmul.f32.vlgmr.msrb.gmra.mxu0 %v586_v57 }
 0x164   : > { %v624_v59 = vpop.f32.mrf.mxu0 }
 0x165   : > { %v625_v60 = vadd.f32 %v858_v58, %v624_v59 }
 0x167   : > { %627 = vst [vmem:[%s291_s11] sm:$0xff] %v625_v60 }
 0x168   : > { %976 = shalt.err (!%p973_p0)
}
 0x169   : > { %782 = dma.vmem_to_hbm [thread:$0]  (%p1153_p2), %s643_s12, 128, %s645_s15, %s629_s16  }
 0x16a PF: > { %s656_s25 = sand.u32 1, %s1015_s18   ;;  %p796_p4 = pnand %p750_p10, %p1118_p5 }
 0x16b   : > { %s657_s27 = scalar_lea.sflag [#allocation4], %s656_s25 }
 0x16c   : > { %p797_p6 = pneg %p796_p4 }
 0x16e   : > { %1010 = dma.done.wait (%p797_p6), %s657_s27, 128  }
 0x16f   : > { %1012 = vsyncadd (%p797_p6), %s657_s27, 4294967168  ;;  %s22_s23 = sadd.s32 1, %s1035_s23   ;;  %s1285_s18 = smov %s1019_s19 }
 0x170   : > { %p19_p8 = scmp.ge.s32.totalorder %s22_s23, 4   ;;  %s1286_s19 = smov %s1023_s20 }
 0x171   : > { %s1287_s20 = smov %s1163_s9  ;;  %s1288_s21 = smov %s1031_s22 }
 0x172   : > { %s1289_s22 = smov %s1291_s17  ;;  %21 = sbr.rel (!%p19_p8) target bundleno = 10 (0xa), region = 101 }
 0x177   :  { %663 = vsyncpa [#allocation3], 1 }
 0x178   :  { %665 = vsyncpa [#allocation3 + $0x1], 1 }
 0x179   :  { %666 = vsyncpa [#allocation6], 1 }
 0x17a   :  { %667 = vsyncpa [#allocation4], 1 }
 0x17b   :  { %669 = vsyncpa [#allocation4 + $0x1], 1 }

// kernel: tpu_custom_call.1
= control target key start
LH: loop header
LB: loop body
LE: loop exit
PB: predicated region body
PF: predicated region fallthrough
CT: control target
= control target key end

     0   :  { %s1266_s0 = inlined_call_operand.hbm [shape: f32[2,16,64], index: 0, kind: input, shape index: {}]   ;;  %s1267_s1 = inlined_call_operand.hbm [shape: f32[8,64,128], index: 1, kind: input, shape index: {}]   ;;  %s1268_s2 = inlined_call_operand.vmem [shape: f32[1,128], index: 2, kind: input, shape index: {}]   ;;  %s1269_s3 = inlined_call_operand.hbm [shape: f32[128,128], index: 3, kind: input, shape index: {}]   ;;  %s1270_s4 = inlined_call_operand.vmem [shape: f32[1,128], index: 4, kind: input, shape index: {}]   ;;  %s1271_s5 = inlined_call_operand.hbm [shape: f32[2,8,128], index: 5, kind: output, shape index: {}]  }
   0x1   :  { %1274 = sst [smem:[#allocation12_spill]] %s1267_s1 }
   0x2   :  { %1275 = sst [smem:[#allocation13_spill]] %s1269_s3 }
   0x3   :  { %10 = vsyncpa [#allocation3], 0 }
   0x4   :  { %12 = vsyncpa [#allocation3 + $0x1], 0 }
   0x5   :  { %13 = vsyncpa [#allocation6], 0 }
   0x6   :  { %14 = vsyncpa [#allocation4], 0 }
   0x7   :  { %16 = vsyncpa [#allocation4 + $0x1], 0  ;;  %s1071_s18 = smov 0   ;;  %s1073_s19 = smov 0  }
   0x8   :  { %s1075_s20 = smov 0   ;;  %s1077_s21 = smov 0  }
   0x9   :  { %s1079_s22 = smov 0   ;;  %s1081_s23 = smov 0  }
   0xa LB: > { %s745_s24 = sadd.s32 4294967295, %s1035_s23   ;;  %s746_s25 = sadd.s32 4294967294, %s1035_s23   ;;  %s1035_s23 = sphi %s1081_s23, %s22_s23   ;;  %s1031_s22 = sphi %s1079_s22, %s1289_s22   ;;  %s1027_s21 = sphi %s1077_s21, %s1288_s21   ;;  %s1023_s20 = sphi %s1075_s20, %s1287_s20   ;;  %s1019_s19 = sphi %s1073_s19, %s1286_s19   ;;  %s1015_s18 = sphi %s1071_s18, %s1285_s18  }
   0xb   : > { %p54_p0 = scmp.ne.s32.totalorder %s1019_s19, %s1015_s18  ;;  %p1107_p1 = scmp.eq.s32.totalorder %s745_s24, 0 }
   0xc   : > { %p170_p2 = scmp.eq.s32.totalorder %s746_s25, 1  ;;  %p747_p4 = scmp.ge.s32.totalorder %s1035_s23, 1 }
   0xd   : > { %p1113_p3 = por %p1107_p1, %p54_p0  ;;  %p177_p6 = scmp.lt.s32.totalorder %s1035_s23, 3 }
   0xe   : > { %p1118_p5 = por %p170_p2, %p54_p0  ;;  %s1279_s1 = sld [smem:[#allocation12_spill]] }
   0xf   : > { %p1126_p7 = pnand %p747_p4, %p177_p6  ;;  %s1037_s8 = smov [#allocation5]  }
  0x10   : > { %s190_s9 = sshll.u32 %s1037_s8, 4  ;;  %p750_p10 = scmp.ge.s32.totalorder %s1035_s23, 2  ;;  %s191_s9 = int_to_ptr.vmem [resolvable:$true] %s190_s9 }
  0x11   : > { %p784_p8 = pneg %p1126_p7  ;;  %s1281_s3 = sld [smem:[#allocation13_spill]] }
  0x12   : > { %s1272_s13 = smov 128   ;;  %s1273_s14 = smov 8  }
  0x13   : > { %p785_p9 = pnand %p784_p8, %p1107_p1  ;;  %s1040_s15 = smov [#allocation7]  }
  0x14   : > { %s188_s6 = sshll.u32 %s1279_s1, 4  ;;  %s207_s16 = sshll.u32 %s1040_s15, 4  ;;  %s189_s6 = int_to_ptr.hbm [resolvable:$true] %s188_s6  ;;  %s208_s16 = int_to_ptr.vmem [resolvable:$true] %s207_s16 }
  0x15   : > { %787 = dma.hbm_to_vmem [thread:$0]  (!%p785_p9), %s189_s6, 8192, %s191_s9, [#allocation6], %s1272_s13, %s1272_s13, %s1273_s14  }
  0x16   : > { %p164_p11 = scmp.eq.s32.totalorder %s745_s24, 1  ;;  %s34_s17 = sadd.s32 1, %s1031_s22 }
  0x17   : > { %s205_s12 = sshll.u32 %s1281_s3, 4  ;;  %p36_p12 = scmp.ge.s32.totalorder %s34_s17, 2  ;;  %s206_s12 = int_to_ptr.hbm [resolvable:$true] %s205_s12 }
  0x18   : > { %790 = dma.hbm_to_vmem [thread:$0]  (!%p785_p9), %s206_s12, 2048, %s208_s16, [#allocation6], %s1272_s13, %s1272_s13, %s1273_s14  }
  0x19   : > { %s41_s25 = sadd.s32 1, %s1023_s20  ;;  %p48_p13 = scmp.ne.s32.totalorder %s1023_s20, %s1019_s19 }
  0x1a   : > { %p49_p0 = scmp.eq.s32.totalorder %s1035_s23, 0  ;;  %s1291_s17 = smov (%p36_p12, %s34_s17), 0 }
  0x1b   : > { %p1153_p2 = por %p164_p11, %p48_p13  ;;  %p801_p4 = scmp.lt.s32.totalorder %s1035_s23, 2 }
  0x1c   : > { %s38_s30 = ssub.s32 %s1031_s22, %s1291_s17  ;;  %s224_s6 = sand.u32 1, %s1023_s20  }
  0x1d   : > { %p39_p6 = scmp.eq.s32.totalorder %s38_s30, 0  ;;  %p50_p8 = por %p49_p0, %p48_p13 }
  0x1e   : > { %s751_s8 = sshll.u32 %s224_s6, 4  ;;  %s771_s24 = sshll.u32 %s1031_s22, 4 }
  0x1f   : > { %s1163_s9 = scalar_select %p39_p6, %s1023_s20, %s41_s25  }
  0x20   : > { %s233_s12 = scalar_lea.hbm %s1266_s0, %s771_s24  ;;  %s228_s16 = scalar_lea.vmem [#allocation2], %s751_s8 }
  0x21   : > { %s234_s15 = sshll.u32 %s233_s12, 4  ;;  %s236_s13 = sshll.u32 %s228_s16, 4  ;;  %s235_s15 = int_to_ptr.hbm [resolvable:$true] %s234_s15  ;;  %s237_s13 = int_to_ptr.vmem [resolvable:$true] %s236_s13 }
  0x22   : > { %p792_p9 = pnand %p801_p4, %p50_p8  ;;  %s225_s14 = scalar_lea.sflag [#allocation3], %s224_s6 }
  0x23   : > { %s1283_s1 = smov 8   ;;  %s1284_s3 = smov 128  }
  0x24   : > { %794 = dma.hbm_to_vmem [thread:$0]  (!%p792_p9), %s235_s15, 256, %s237_s13, %s225_s14, %s1284_s3, %s1284_s3, %s1283_s1  }
  0x25   : > { %248 = sbr.rel (%p1126_p7) target bundleno = 362 (0x16a), region = 40  ;;  %s1176_s25 = sand.u32 (!%p1126_p7), 1, %s1019_s19  }
  0x26   : > { %s755_s30 = sshll.u32 (!%p1126_p7), %s1176_s25, 4  ;;  %s251_s8 = scalar_lea.sflag (!%p1126_p7), [#allocation3], %s1176_s25 }
  0x27   : > { %s1180_s24 = scalar_lea.vmem (!%p1126_p7), [#allocation2], %s755_s30 }
  0x2a   : > { %1002 = dma.done.wait (%p1113_p3), %s251_s8, 256  }
  0x2b   : > { %1004 = vsyncadd (%p1113_p3), %s251_s8, 4294967040 }
  0x2c   : > { %1006 = dma.done.wait (%p1107_p1), [#allocation6], 10240  }
  0x2d   : > { %1008 = vsyncadd (%p1107_p1), [#allocation6], 4294957056  ;;  %v312_v0 = vld [vmem:[#allocation5 + $0x78] sm:$0xff]  ;;  %v311_v1 = vld [vmem:[#allocation5 + $0x70] sm:$0xff]  ;;  %vm315_vm0 = vcmask 1046528   ;;  %vm373_vm1 = vcmask 1045504  }
  0x2e   : > { %330 = vmatpush.msra.mxu1 %v312_v0  ;;  %v310_v2 = vld [vmem:[#allocation5 + $0x68] sm:$0xff]  ;;  %v372_v3 = vld [vmem:[#allocation5 + $0xb8] sm:$0xff]  ;;  %v371_v4 = vld [vmem:[#allocation5 + $0xb0] sm:$0xff]  ;;  %vm319_vm2 = vcmask 523264   ;;  %vm409_vm3 = vcmask 1044480   ;;  %vm445_vm4 = vcmask 1043456  }
  0x2f   : > { %387 = vmatpush.msra.mxu2 %v372_v3  ;;  %v408_v5 = vld [vmem:[#allocation5 + $0xf8] sm:$0xff]  ;;  %v309_v6 = vld [vmem:[#allocation5 + $0x60] sm:$0xff]  ;;  %v370_v7 = vld [vmem:[#allocation5 + $0xa8] sm:$0xff]  ;;  %vm517_vm5 = vcmask 1041408   ;;  %vm553_vm6 = vcmask 1040384   ;;  %vm481_vm7 = vcmask 1042432  }
  0x30   : > { %331 = vmatpush.msra.mxu1 %v311_v1  ;;  %423 = vmatpush.msra.mxu3 %v408_v5  ;;  %v407_v8 = vld [vmem:[#allocation5 + $0xf0] sm:$0xff]  ;;  %v406_v9 = vld [vmem:[#allocation5 + $0xe8] sm:$0xff]  ;;  %v308_v10 = vld [vmem:[#allocation5 + $0x58] sm:$0xff]  ;;  %s758_s26 = sshll.u32 %s1176_s25, 3  ;;  %s768_s27 = sshll.u32 %s1027_s21, 3 }
  0x31   : > { %388 = vmatpush.msra.mxu2 %v371_v4  ;;  %v369_v11 = vld [vmem:[#allocation5 + $0xa0] sm:$0xff]  ;;  %v307_v12 = vld [vmem:[#allocation5 + $0x50] sm:$0xff]  ;;  %v444_v14 = vld [vmem:[#allocation5 + $0x138] sm:$0xff]  ;;  %s640_s14 = scalar_lea.hbm %s1271_s5, %s768_s27  ;;  %s291_s11 = scalar_lea.vmem [#allocation8], %s758_s26 }
  0x32   : > { %332 = vmatpush.msra.mxu1 %v310_v2  ;;  %424 = vmatpush.msra.mxu3 %v407_v8  ;;  %v405_v13 = vld [vmem:[#allocation5 + $0xe0] sm:$0xff]  ;;  %v368_v15 = vld [vmem:[#allocation5 + $0x98] sm:$0xff]  ;;  %v443_v19 = vld [vmem:[#allocation5 + $0x130] sm:$0xff]  ;;  %s642_s12 = sshll.u32 %s291_s11, 4  ;;  %s644_s15 = sshll.u32 %s640_s14, 4  ;;  %s643_s12 = int_to_ptr.vmem [resolvable:$true] %s642_s12  ;;  %s645_s15 = int_to_ptr.hbm [resolvable:$true] %s644_s15 }
  0x33   : > { %389 = vmatpush.msra.mxu2 %v370_v7  ;;  %459 = vmatpush.msra.mxu0 %v444_v14  ;;  %v1191_v16 = vld [vmem:[%s1180_s24] sm:$0xff]  ;;  %v1194_v17 = vld [vmem:[%s1180_s24 + $0x8] sm:$0xff]  ;;  %s629_s16 = scalar_lea.sflag [#allocation4], %s1176_s25  ;;  %s963_s30 = sshra.s32 %s645_s15, 4  ;;  %s964_s30 = int_to_ptr.hbm [resolvable:$true] %s963_s30 }
  0x34   : > { %333 = vmatpush.msra.mxu1 %v309_v6  ;;  %425 = vmatpush.msra.mxu3 %v406_v9  ;;  %v404_v18 = vld [vmem:[#allocation5 + $0xd8] sm:$0xff]  ;;  %v306_v20 = vld [vmem:[#allocation5 + $0x48] sm:$0xff]  ;;  %v367_v21 = vld [vmem:[#allocation5 + $0x90] sm:$0xff]  ;;  %v316_v22 = vrot.slane %v1191_v16, 1  ;;  %v317_v23 = vrot.slane %v1194_v17, 1  ;;  %v374_v26 = vrot.slane %v1191_v16, 2  ;;  %p970_p11 = scmp.lt.s32.totalorder %s964_s30, %s1271_s5 }
  0x35   : > { %390 = vmatpush.msra.mxu2 %v369_v11  ;;  %460 = vmatpush.msra.mxu0 %v443_v19  ;;  %v403_v24 = vld [vmem:[#allocation5 + $0xd0] sm:$0xff]  ;;  %v442_v25 = vld [vmem:[#allocation5 + $0x128] sm:$0xff]  ;;  %v375_v27 = vrot.slane %v1194_v17, 2  ;;  %v305_v28 = vld [vmem:[#allocation5 + $0x40] sm:$0xff]  ;;  %v410_v33 = vrot.slane %v1191_v16, 3  ;;  %v411_v34 = vrot.slane %v1194_v17, 3 }
  0x36   : > { %334 = vmatpush.msra.mxu1 %v308_v10  ;;  %426 = vmatpush.msra.mxu3 %v405_v13  ;;  %v366_v29 = vld [vmem:[#allocation5 + $0x88] sm:$0xff]  ;;  %v441_v30 = vld [vmem:[#allocation5 + $0x120] sm:$0xff]  ;;  %v303_v31 = vld [vmem:[#allocation5 + $0x38] sm:$0xff]  ;;  %v318_v35 = vsel %vm315_vm0, %v316_v22, %v317_v23  ;;  %v446_v52 = vrot.slane %v1191_v16, 4  ;;  %v447_v54 = vrot.slane %v1194_v17, 4  ;;  %v518_v2 = vrot.slane %v1191_v16, 6 }
  0x37   : > { %391 = vmatpush.msra.mxu2 %v368_v15  ;;  %461 = vmatpush.msra.mxu0 %v442_v25  ;;  %v402_v32 = vld [vmem:[#allocation5 + $0xc8] sm:$0xff]  ;;  %v365_v36 = vld [vmem:[#allocation5 + $0x80] sm:$0xff]  ;;  %v302_v37 = vld [vmem:[#allocation5 + $0x30] sm:$0xff]  ;;  %v376_v38 = vsel %vm373_vm1, %v374_v26, %v375_v27  ;;  %v412_v42 = vsel %vm409_vm3, %v410_v33, %v411_v34  ;;  %v519_v3 = vrot.slane %v1194_v17, 6  ;;  %v554_v7 = vrot.slane %v1191_v16, 7  ;;  %s965_s21 = scalar_lea.hbm %s964_s30, 8 }
  0x38   : > { %335 = vmatpush.msra.mxu1 %v307_v12  ;;  %427 = vmatpush.msra.mxu3 %v404_v18  ;;  %v516_v39 = vld [vmem:[#allocation5 + $0x1b8] sm:$0xff]  ;;  %v401_v40 = vld [vmem:[#allocation5 + $0xc0] sm:$0xff]  ;;  %v301_v41 = vld [vmem:[#allocation5 + $0x28] sm:$0xff]  ;;  %v448_v61 = vsel %vm445_vm4, %v446_v52, %v447_v54  ;;  %v555_v8 = vrot.slane %v1194_v17, 7  ;;  %p966_p1 = scmp.ne.s32.totalorder %s964_s30, %s965_s21  ;;  %s969_s1 = scalar_lea.hbm %s1271_s5, 16 }
  0x39   : > { %392 = vmatpush.msra.mxu2 %v367_v21  ;;  %462 = vmatpush.msra.mxu0 %v441_v30  ;;  %v515_v43 = vld [vmem:[#allocation5 + $0x1b0] sm:$0xff]  ;;  %v552_v44 = vld [vmem:[#allocation5 + $0x1f8] sm:$0xff]  ;;  %v300_v45 = vld [vmem:[#allocation5 + $0x20] sm:$0xff]  ;;  %v520_v11 = vsel %vm517_vm5, %v518_v2, %v519_v3  ;;  %v483_v21 = vrot.slane %v1194_v17, 5  ;;  %p971_p12 = scmp.lt.s32.totalorder %s969_s1, %s965_s21 }
  0x3a   : > { %336 = vmatpush.msra.mxu1 %v306_v20  ;;  %428 = vmatpush.msra.mxu3 %v403_v24  ;;  %v440_v46 = vld [vmem:[#allocation5 + $0x118] sm:$0xff]  ;;  %v514_v47 = vld [vmem:[#allocation5 + $0x1a8] sm:$0xff]  ;;  %v551_v48 = vld [vmem:[#allocation5 + $0x1f0] sm:$0xff]  ;;  %v556_v14 = vsel %vm553_vm6, %v554_v7, %v555_v8  ;;  %v482_v20 = vrot.slane %v1191_v16, 5  ;;  %p967_p3 = pnand %p966_p1, %p1153_p2 }
  0x3b   : > { %393 = vmatpush.msra.mxu2 %v366_v29  ;;  %v299_v49 = vld [vmem:[#allocation5 + $0x18] sm:$0xff]  ;;  %v439_v50 = vld [vmem:[#allocation5 + $0x110] sm:$0xff]  ;;  %v513_v51 = vld [vmem:[#allocation5 + $0x1a0] sm:$0xff]  ;;  %463 = vmatpush.msra.mxu0 %v440_v46  ;;  %p972_p13 = por %p971_p12, %p970_p11 }
  0x3c   : > { %337 = vmatpush.msra.mxu1 %v305_v28  ;;  %429 = vmatpush.msra.mxu3 %v402_v32  ;;  %v550_v53 = vld [vmem:[#allocation5 + $0x1e8] sm:$0xff]  ;;  %v298_v55 = vld [vmem:[#allocation5 + $0x10] sm:$0xff]  ;;  %v512_v57 = vld [vmem:[#allocation5 + $0x198] sm:$0xff]  ;;  %v484_v24 = vsel %vm481_vm7, %v482_v20, %v483_v21  ;;  %p968_p7 = pneg %p967_p3 }
  0x3d   : > { %759 = vmatmul.msk.f32.vlgmr.msra.gmra.mxu1 %vm319_vm2, %v318_v35  ;;  %394 = vmatpush.msra.mxu2 %v365_v36  ;;  %v438_v56 = vld [vmem:[#allocation5 + $0x108] sm:$0xff]  ;;  %v549_v58 = vld [vmem:[#allocation5 + $0x1e0] sm:$0xff]  ;;  %v511_v62 = vld [vmem:[#allocation5 + $0x190] sm:$0xff] }
  0x3e   : > { %352 = vmatpush.msrb.mxu1 %v303_v31  ;;  %761 = vmatmul.msk.f32.vlgmr.msra.gmra.mxu2 %vm319_vm2, %v376_v38  ;;  %v297_v59 = vld [vmem:[#allocation5 + $0x8] sm:$0xff]  ;;  %v437_v60 = vld [vmem:[#allocation5 + $0x100] sm:$0xff]  ;;  %v548_v0 = vld [vmem:[#allocation5 + $0x1d8] sm:$0xff]  ;;  %p973_p0 = pnand %p972_p13, %p968_p7 }
  0x3f   : > { %531 = vmatpush.msrb.mxu2 %v516_v39  ;;  %430 = vmatpush.msra.mxu3 %v401_v40  ;;  %v296_v63 = vld [vmem:[#allocation5] sm:$0xff]  ;;  %v510_v1 = vld [vmem:[#allocation5 + $0x188] sm:$0xff]  ;;  %v480_v4 = vld [vmem:[#allocation5 + $0x178] sm:$0xff] }
  0x40   : > { %353 = vmatpush.msrb.mxu1 %v302_v37  ;;  %762 = vmatmul.msk.f32.vlgmr.msra.gmra.mxu3 %vm319_vm2, %v412_v42  ;;  %v547_v5 = vld [vmem:[#allocation5 + $0x1d0] sm:$0xff]  ;;  %v509_v6 = vld [vmem:[#allocation5 + $0x180] sm:$0xff]  ;;  %v546_v10 = vld [vmem:[#allocation5 + $0x1c8] sm:$0xff] }
  0x41   : > { %532 = vmatpush.msrb.mxu2 %v515_v43  ;;  %567 = vmatpush.msrb.mxu3 %v552_v44  ;;  %v479_v9 = vld [vmem:[#allocation5 + $0x170] sm:$0xff]  ;;  %v478_v12 = vld [vmem:[#allocation5 + $0x168] sm:$0xff]  ;;  %v545_v13 = vld [vmem:[#allocation5 + $0x1c0] sm:$0xff] }
  0x42   : > { %354 = vmatpush.msrb.mxu1 %v301_v41  ;;  %464 = vmatpush.msra.mxu0 %v439_v50  ;;  %v477_v15 = vld [vmem:[#allocation5 + $0x160] sm:$0xff]  ;;  %v476_v18 = vld [vmem:[#allocation5 + $0x158] sm:$0xff]  ;;  %v475_v19 = vld [vmem:[#allocation5 + $0x150] sm:$0xff] }
  0x43   : > { %533 = vmatpush.msrb.mxu2 %v514_v47  ;;  %568 = vmatpush.msrb.mxu3 %v551_v48  ;;  %v474_v22 = vld [vmem:[#allocation5 + $0x148] sm:$0xff]  ;;  %v473_v23 = vld [vmem:[#allocation5 + $0x140] sm:$0xff]  ;;  %v602_v25 = vld [vmem:[#allocation7 + $0x78] sm:$0xff] }
  0x44   : > { %355 = vmatpush.msrb.mxu1 %v300_v45  ;;  %465 = vmatpush.msra.mxu0 %v438_v56  ;;  %v601_v26 = vld [vmem:[#allocation7 + $0x70] sm:$0xff]  ;;  %v600_v27 = vld [vmem:[#allocation7 + $0x68] sm:$0xff]  ;;  %v599_v28 = vld [vmem:[#allocation7 + $0x60] sm:$0xff] }
  0x45   : > { %534 = vmatpush.msrb.mxu2 %v513_v51  ;;  %569 = vmatpush.msrb.mxu3 %v550_v53  ;;  %v597_v17 = vld [vmem:[#allocation7 + $0x50] sm:$0xff]  ;;  %v596_v29 = vld [vmem:[#allocation7 + $0x48] sm:$0xff]  ;;  %v595_v30 = vld [vmem:[#allocation7 + $0x40] sm:$0xff] }
  0x46   : > { %356 = vmatpush.msrb.mxu1 %v299_v49  ;;  %466 = vmatpush.msra.mxu0 %v437_v60  ;;  %v594_v31 = vld [vmem:[#allocation7 + $0x38] sm:$0xff]  ;;  %v593_v32 = vld [vmem:[#allocation7 + $0x30] sm:$0xff]  ;;  %v592_v33 = vld [vmem:[#allocation7 + $0x28] sm:$0xff] }
  0x47   : > { %535 = vmatpush.msrb.mxu2 %v512_v57  ;;  %570 = vmatpush.msrb.mxu3 %v549_v58  ;;  %v591_v34 = vld [vmem:[#allocation7 + $0x20] sm:$0xff]  ;;  %v590_v35 = vld [vmem:[#allocation7 + $0x18] sm:$0xff]  ;;  %v589_v37 = vld [vmem:[#allocation7 + $0x10] sm:$0xff] }
  0x48   : > { %357 = vmatpush.msrb.mxu1 %v298_v55  ;;  %763 = vmatmul.msk.f32.vlgmr.msra.gmra.mxu0 %vm319_vm2, %v448_v61  ;;  %v588_v38 = vld [vmem:[#allocation7 + $0x8] sm:$0xff]  ;;  %v587_v39 = vld [vmem:[#allocation7] sm:$0xff] }
  0x49   : > { %536 = vmatpush.msrb.mxu2 %v511_v62  ;;  %571 = vmatpush.msrb.mxu3 %v548_v0  ;;  %v857_v53 = vld [vmem:[%s1268_s2] ss:$0 sm:$0xff] }
  0x4a   : > { %358 = vmatpush.msrb.mxu1 %v297_v59  ;;  %607 = vmatpush.msrb.mxu0 %v602_v25  ;;  %v858_v58 = vld [vmem:[%s1270_s4] ss:$0 sm:$0xff] }
  0x4b   : > { %537 = vmatpush.msrb.mxu2 %v510_v1  ;;  %572 = vmatpush.msrb.mxu3 %v547_v5 }
  0x4c   : > { %359 = vmatpush.msrb.mxu1 %v296_v63  ;;  %608 = vmatpush.msrb.mxu0 %v601_v26 }
  0x4d   : > { %760 = vmatmul.msk.f32.vlgmr.msrb.gmra.mxu1 %vm319_vm2, %v1191_v16  ;;  %538 = vmatpush.msrb.mxu2 %v509_v6  ;;  %v598_v16 = vld [vmem:[#allocation7 + $0x58] sm:$0xff] }
  0x4e   : > { %495 = vmatpush.msra.mxu1 %v480_v4  ;;  %573 = vmatpush.msrb.mxu3 %v546_v10 }
  0x4f   : > { %765 = vmatmul.msk.f32.vlgmr.msrb.gmra.mxu2 %vm319_vm2, %v520_v11  ;;  %609 = vmatpush.msrb.mxu0 %v600_v27 }
  0x50   : > { %496 = vmatpush.msra.mxu1 %v479_v9  ;;  %574 = vmatpush.msrb.mxu3 %v545_v13 }
  0x51   : > { %766 = vmatmul.msk.f32.vlgmr.msrb.gmra.mxu3 %vm319_vm2, %v556_v14  ;;  %610 = vmatpush.msrb.mxu0 %v599_v28 }
  0x52   : > { %497 = vmatpush.msra.mxu1 %v478_v12 }
  0x53   : > { %611 = vmatpush.msrb.mxu0 %v598_v16 }
  0x54   : > { %498 = vmatpush.msra.mxu1 %v477_v15 }
  0x55   : > { %612 = vmatpush.msrb.mxu0 %v597_v17 }
  0x56   : > { %499 = vmatpush.msra.mxu1 %v476_v18 }
  0x57   : > { %613 = vmatpush.msrb.mxu0 %v596_v29 }
  0x58   : > { %500 = vmatpush.msra.mxu1 %v475_v19 }
  0x59   : > { %614 = vmatpush.msrb.mxu0 %v595_v30 }
  0x5a   : > { %501 = vmatpush.msra.mxu1 %v474_v22 }
  0x5b   : > { %615 = vmatpush.msrb.mxu0 %v594_v31 }
  0x5c   : > { %502 = vmatpush.msra.mxu1 %v473_v23 }
  0x5d   : > { %764 = vmatmul.msk.f32.vlgmr.msra.gmra.mxu1 %vm319_vm2, %v484_v24  ;;  %616 = vmatpush.msrb.mxu0 %v593_v32 }
  0x5f   : > { %617 = vmatpush.msrb.mxu0 %v592_v33 }
  0x61   : > { %618 = vmatpush.msrb.mxu0 %v591_v34 }
  0x63   : > { %619 = vmatpush.msrb.mxu0 %v590_v35 }
  0x65   : > { %620 = vmatpush.msrb.mxu0 %v589_v37 }
  0x67   : > { %621 = vmatpush.msrb.mxu0 %v588_v38 }
  0x69   : > { %622 = vmatpush.msrb.mxu0 %v587_v39 }
  0xba   : > { %v339_v36 = vpop.f32.mrf.mxu1 }
  0xc1   : > { %v396_v42 = vpop.f32.mrf.mxu2 }
  0xc3   : > { %v432_v44 = vpop.f32.mrf.mxu3 }
  0xc5   : > { %v468_v46 = vpop.f32.mrf.mxu0 }
  0xca   : > { %v361_v40 = vpop.f32.mrf.mxu1 }
  0xcb   : > { %v362_v41 = vadd.f32 %v361_v40, %v339_v36 }
  0xcd   : > { %v399_v43 = vadd.f32 %v396_v42, %v362_v41 }
  0xcf   : > { %v435_v45 = vadd.f32 %v432_v44, %v399_v43 }
  0xd1   : > { %v471_v47 = vadd.f32 %v468_v46, %v435_v45 }
  0xd2   : > { %v540_v49 = vpop.f32.mrf.mxu2 }
  0xd4   : > { %v576_v51 = vpop.f32.mrf.mxu3 }
  0xda   : > { %v504_v48 = vpop.f32.mrf.mxu1 }
  0xdb   : > { %v507_v50 = vadd.f32 %v504_v48, %v471_v47 }
  0xdd   : > { %v543_v52 = vadd.f32 %v540_v49, %v507_v50 }
  0xdf   : > { %v579_v54 = vadd.f32 %v576_v51, %v543_v52 }
  0xe1   : > { %v584_v55 = vadd.f32 %v857_v53, %v579_v54 }
  0xe3   : > { %v585_v56 = vmax.f32 %v584_v55, 0.0 }
  0xe5   : > { %v586_v57 = vmin.f32 %v585_v56, 6.0 }
  0xe7   : > { %623 = vmatmul.f32.vlgmr.msrb.gmra.mxu0 %v586_v57 }
 0x164   : > { %v624_v59 = vpop.f32.mrf.mxu0 }
 0x165   : > { %v625_v60 = vadd.f32 %v858_v58, %v624_v59 }
 0x167   : > { %627 = vst [vmem:[%s291_s11] sm:$0xff] %v625_v60 }
 0x168   : > { %976 = shalt.err (!%p973_p0)
}
 0x169   : > { %782 = dma.vmem_to_hbm [thread:$0]  (%p1153_p2), %s643_s12, 128, %s645_s15, %s629_s16  }
 0x16a PF: > { %s656_s25 = sand.u32 1, %s1015_s18   ;;  %p796_p4 = pnand %p750_p10, %p1118_p5 }
 0x16b   : > { %s657_s27 = scalar_lea.sflag [#allocation4], %s656_s25 }
 0x16c   : > { %p797_p6 = pneg %p796_p4 }
 0x16e   : > { %1010 = dma.done.wait (%p797_p6), %s657_s27, 128  }
 0x16f   : > { %1012 = vsyncadd (%p797_p6), %s657_s27, 4294967168  ;;  %s22_s23 = sadd.s32 1, %s1035_s23   ;;  %s1285_s18 = smov %s1019_s19 }
 0x170   : > { %p19_p8 = scmp.ge.s32.totalorder %s22_s23, 4   ;;  %s1286_s19 = smov %s1023_s20 }
 0x171   : > { %s1287_s20 = smov %s1163_s9  ;;  %s1288_s21 = smov %s1031_s22 }
 0x172   : > { %s1289_s22 = smov %s1291_s17  ;;  %21 = sbr.rel (!%p19_p8) target bundleno = 10 (0xa), region = 101 }
 0x177   :  { %663 = vsyncpa [#allocation3], 1 }
 0x178   :  { %665 = vsyncpa [#allocation3 + $0x1], 1 }
 0x179   :  { %666 = vsyncpa [#allocation6], 1 }
 0x17a   :  { %667 = vsyncpa [#allocation4], 1 }
 0x17b   :  { %669 = vsyncpa [#allocation4 + $0x1], 1 }

</bundles_post_ra>
